<compile_context>
chip_gen: v5e
topology: v5e:2x2
jax: 0.10.0
libtpu: 0.0.40
codegen_flags: <defaults>
</compile_context>

<pallas_src>
import functools

import jax
import jax.numpy as jnp
from jax.experimental import pallas as pl
from jax.experimental.pallas import tpu as pltpu


# ---------------------------------------------------------------------------
# Fused kernel: conv3x3 (single im2col matmul) + bias + ReLU
#               + global average pool (ones matmul) + linear head.
#
#   x_ref   : (BB, H+K-1, W+K-1, C)  padded NHWC images (bf16)
#   pool_ref: (BB, BB*H*W)           block-diagonal ones matrix (bf16)
#   cw_ref  : (K*K*C, CP)            conv weight, Cout zero-padded to CP (bf16)
#   cb_ref  : (1, CP)                conv bias (f32, padding lanes 0)
#   lw_ref  : (CP, NP)               linear weight, classes padded to NP (bf16)
#   lb_ref  : (1, NP)                linear bias (f32, padding lanes 0)
#   out_ref : (BB, 1, NP)            logits rows for this batch block (f32)
# ---------------------------------------------------------------------------
def _fused_net_kernel(x_ref, pool_ref, cw_ref, cb_ref, lw_ref, lb_ref, out_ref,
                      *, BB, H, W, C, K):
    rows = x_ref[...]                                   # (BB, H+K-1, W+K-1, C)

    # Single im2col tile (M, K*K*C); tap-major / channel-minor column order
    # matches cw_ref's row layout.
    taps = [rows[:, di:di + H, dj:dj + W, :]
            for di in range(K) for dj in range(K)]
    patches = jnp.concatenate(taps, axis=-1).reshape(BB * H * W, K * K * C)

    # ONE MXU push for the whole conv (no per-tap f32 VPU accumulate chain).
    acc = jnp.dot(patches, cw_ref[...], preferred_element_type=jnp.float32)
    feat = jnp.maximum(acc + cb_ref[...], 0.0)          # (M, CP) f32

    # Global average pool as a block-diagonal ones matmul (MXU, not XLU).
    pooled = jnp.dot(pool_ref[...], feat.astype(pool_ref.dtype),
                     preferred_element_type=jnp.float32)
    pooled = pooled * (1.0 / float(H * W))              # (BB, CP) f32

    logits = jnp.dot(pooled.astype(lw_ref.dtype), lw_ref[...],
                     preferred_element_type=jnp.float32) + lb_ref[...]
    out_ref[...] = logits.reshape(BB, 1, -1).astype(out_ref.dtype)


def _choose_batch_block(B, HW, target_hi=2048):
    """Pick BB so M = BB*HW trends toward 512-2048 while keeping >=2 grid
    steps when B >= 2 (feeds both v7x TensorCores)."""
    cap = B if B < 2 else B // 2
    bb = max(1, min(cap, max(1, target_hi // HW)))
    while B % bb:
        bb -= 1
    return bb


def fused_net_forward(xp, conv_w, conv_b, lin_w, lin_b, *, H, W, ksize):
    """xp: (B, H+K-1, W+K-1, C) padded NHWC (bf16). Returns padded logits (B, NP)."""
    B, HP, WP, C = xp.shape
    K = ksize
    CP = lin_w.shape[0]
    NP = lin_w.shape[1]
    assert conv_w.shape == (K * K * C, CP)

    BB = _choose_batch_block(B, H * W)
    M = BB * H * W

    # Block-diagonal "ones" pooling matrix: per-image pixel sums via one MXU push.
    pool_mat = (jnp.arange(BB)[:, None] ==
                (jnp.arange(M)[None, :] // (H * W))).astype(jnp.bfloat16)

    kernel = functools.partial(_fused_net_kernel, BB=BB, H=H, W=W, C=C, K=K)

    # TODO(synk): for large images add a row-tiled halo-DMA path (or raise
    # vmem_limit_bytes); the whole-image-per-step block here assumes the
    # double-buffered input (~2*BB*HP*WP*C*2 bytes) fits comfortably in VMEM,
    # which is true for these small shapes (~5 KiB/image).
    out = pl.pallas_call(
        kernel,
        out_shape=jax.ShapeDtypeStruct((B, 1, NP), jnp.float32),
        grid=(B // BB,),
        in_specs=[
            # Batch-blocked padded images; block depends only on g, so the
            # next block is prefetched while the current one is computed.
            pl.BlockSpec((BB, HP, WP, C), lambda g: (g, 0, 0, 0)),
            pl.BlockSpec((BB, M), lambda g: (0, 0)),
            pl.BlockSpec((K * K * C, CP), lambda g: (0, 0)),
            pl.BlockSpec((1, CP), lambda g: (0, 0)),
            pl.BlockSpec((CP, NP), lambda g: (0, 0)),
            pl.BlockSpec((1, NP), lambda g: (0, 0)),
        ],
        out_specs=pl.BlockSpec((BB, 1, NP), lambda g: (g, 0, 0)),
        compiler_params=pltpu.CompilerParams(
            dimension_semantics=("parallel",)),
    )(xp, pool_mat, conv_w, conv_b, lin_w, lin_b)
    return out[:, 0, :]                                  # (B, NP)


# ---------------------------------------------------------------------------
# The wrapped "net": Conv3x3(pad=1) -> ReLU -> GlobalAvgPool -> Linear
# ---------------------------------------------------------------------------
class SmallConvNet:
    LANE = 128  # pad output-channel dims to full lanes

    def __init__(self, key, cin=4, cout=8, num_classes=10, ksize=3):
        k1, k2, k3, k4 = jax.random.split(key, 4)
        self.ksize = ksize
        self.cin = cin
        self.cout = cout
        self.num_classes = num_classes
        self.cout_pad = max(self.LANE, cout)
        self.nc_pad = max(self.LANE, num_classes)

        # Conv weight stored flat as (K*K*C, CP): rows ordered (kh, kw, cin),
        # Cout zero-padded to CP, bf16 for the MXU.
        w = jax.random.normal(k1, (ksize * ksize * cin, cout), jnp.float32) * 0.1
        conv_w = jnp.zeros((ksize * ksize * cin, self.cout_pad), jnp.float32)
        conv_w = conv_w.at[:, :cout].set(w)
        self.conv_w = conv_w.astype(jnp.bfloat16)

        b = jax.random.normal(k2, (cout,), jnp.float32) * 0.01
        self.conv_b = jnp.zeros((1, self.cout_pad), jnp.float32).at[0, :cout].set(b)

        lw = jax.random.normal(k3, (cout, num_classes), jnp.float32) * 0.1
        lin_w = jnp.zeros((self.cout_pad, self.nc_pad), jnp.float32)
        lin_w = lin_w.at[:cout, :num_classes].set(lw)
        self.lin_w = lin_w.astype(jnp.bfloat16)

        lb = jax.random.normal(k4, (num_classes,), jnp.float32) * 0.01
        self.lin_b = jnp.zeros((1, self.nc_pad), jnp.float32).at[0, :num_classes].set(lb)

    def __call__(self, x_nchw):
        B, C, H, W = x_nchw.shape
        assert C == self.cin
        pad = self.ksize // 2
        # Glue: NCHW -> NHWC, spatial zero pad, bf16 cast (halves HBM traffic).
        x = jnp.transpose(x_nchw, (0, 2, 3, 1))
        xp = jnp.pad(x, ((0, 0), (pad, pad), (pad, pad),
                         (0, 0))).astype(jnp.bfloat16)
        logits_pad = fused_net_forward(xp, self.conv_w, self.conv_b,
                                       self.lin_w, self.lin_b,
                                       H=H, W=W, ksize=self.ksize)
        return logits_pad[:, :self.num_classes]


class BaseWrapper:
    """forward(x) == self.net(x) — exact semantics of the PyTorch BaseWrapper."""
    # TODO(synk): BaseNet's training/optimizer/epoch/save-load machinery is
    # host-side orchestration (no forward compute) and is not translated.

    def __init__(self, net=None):
        self.net = net

    def __call__(self, x):
        return self.forward(x)

    def forward(self, x):
        return self.net(x)


# ---------------------------------------------------------------------------
# Pure-JAX reference of the same net (same bf16 weights/casts) for sanity check.
# ---------------------------------------------------------------------------
def _reference_forward(net, x_nchw):
    B, C, H, W = x_nchw.shape
    K = net.ksize
    pad = K // 2
    x = jnp.transpose(x_nchw, (0, 2, 3, 1))
    xp = jnp.pad(x, ((0, 0), (pad, pad), (pad, pad), (0, 0))).astype(jnp.bfloat16)
    taps = [xp[:, di:di + H, dj:dj + W, :] for di in range(K) for dj in range(K)]
    patches = jnp.concatenate(taps, axis=-1).reshape(B * H * W, K * K * C)
    acc = jnp.dot(patches, net.conv_w, preferred_element_type=jnp.float32)
    feat = jnp.maximum(acc + net.conv_b, 0.0)
    feat_bf = feat.astype(jnp.bfloat16).astype(jnp.float32)
    pooled = jnp.sum(feat_bf.reshape(B, H * W, net.cout_pad), axis=1) / float(H * W)
    logits = jnp.dot(pooled.astype(jnp.bfloat16), net.lin_w,
                     preferred_element_type=jnp.float32) + net.lin_b
    return logits[:, :net.num_classes]


if __name__ == "__main__":
    key = jax.random.PRNGKey(0)
    k_param, k_data = jax.random.split(key)

    B, C, H, W = 2, 4, 16, 16
    x = jax.random.normal(k_data, (B, C, H, W), jnp.float32)

    net = SmallConvNet(k_param, cin=C, cout=8, num_classes=10, ksize=3)
    model = BaseWrapper(net=net)

    out = jax.block_until_ready(model(x))
    assert out.shape == (B, 10) and out.dtype == jnp.float32

    ref = jax.block_until_ready(_reference_forward(net, x))
    max_err = float(jnp.max(jnp.abs(out - ref)))
    assert max_err < 5e-3, f"mismatch vs reference: {max_err}"

    print("KERNEL_OK")
</pallas_src>

<mosaic_0001>
module attributes {stable_mosaic.version = 11 : i64} {
  func.func @_fused_net_kernel(%arg0: i32, %arg1: memref<1x18x18x4xbf16, #tpu.memory_space<vmem>>, %arg2: memref<1x256xbf16, #tpu.memory_space<vmem>>, %arg3: memref<36x128xbf16, #tpu.memory_space<vmem>>, %arg4: memref<1x128xf32, #tpu.memory_space<vmem>>, %arg5: memref<128x128xbf16, #tpu.memory_space<vmem>>, %arg6: memref<1x128xf32, #tpu.memory_space<vmem>>, %arg7: memref<1x1x128xf32, #tpu.memory_space<vmem>>) attributes {dimension_semantics = [#tpu.dimension_semantics<parallel>], iteration_bounds = array<i64: 2>, scalar_prefetch = 0 : i64, scratch_operands = 0 : i64, tpu.core_type = #tpu.core_type<tc>, window_params = [{transform_indices = @transform_0, window_bounds = array<i64: 1, 18, 18, 4>}, {pipeline_mode = #tpu.pipeline_mode<synchronous>, transform_indices = @transform_1, window_bounds = array<i64: 1, 256>}, {pipeline_mode = #tpu.pipeline_mode<synchronous>, transform_indices = @transform_2, window_bounds = array<i64: 36, 128>}, {pipeline_mode = #tpu.pipeline_mode<synchronous>, transform_indices = @transform_3, window_bounds = array<i64: 1, 128>}, {pipeline_mode = #tpu.pipeline_mode<synchronous>, transform_indices = @transform_4, window_bounds = array<i64: 128, 128>}, {pipeline_mode = #tpu.pipeline_mode<synchronous>, transform_indices = @transform_5, window_bounds = array<i64: 1, 128>}, {transform_indices = @transform_6, window_bounds = array<i64: 1, 1, 128>}]} {
    %c0 = arith.constant 0 : index
    %c0_0 = arith.constant 0 : index
    %c0_1 = arith.constant 0 : index
    %c0_2 = arith.constant 0 : index
    %0 = vector.load %arg1[%c0, %c0_0, %c0_1, %c0_2] : memref<1x18x18x4xbf16, #tpu.memory_space<vmem>>, vector<1x18x18x4xbf16>
    %1 = vector.extract_strided_slice %0 {offsets = [0, 0, 0, 0], sizes = [1, 16, 16, 4], strides = [1, 1, 1, 1]} : vector<1x18x18x4xbf16> to vector<1x16x16x4xbf16>
    %2 = vector.extract_strided_slice %0 {offsets = [0, 0, 1, 0], sizes = [1, 16, 16, 4], strides = [1, 1, 1, 1]} : vector<1x18x18x4xbf16> to vector<1x16x16x4xbf16>
    %3 = vector.extract_strided_slice %0 {offsets = [0, 0, 2, 0], sizes = [1, 16, 16, 4], strides = [1, 1, 1, 1]} : vector<1x18x18x4xbf16> to vector<1x16x16x4xbf16>
    %4 = vector.extract_strided_slice %0 {offsets = [0, 1, 0, 0], sizes = [1, 16, 16, 4], strides = [1, 1, 1, 1]} : vector<1x18x18x4xbf16> to vector<1x16x16x4xbf16>
    %5 = vector.extract_strided_slice %0 {offsets = [0, 1, 1, 0], sizes = [1, 16, 16, 4], strides = [1, 1, 1, 1]} : vector<1x18x18x4xbf16> to vector<1x16x16x4xbf16>
    %6 = vector.extract_strided_slice %0 {offsets = [0, 1, 2, 0], sizes = [1, 16, 16, 4], strides = [1, 1, 1, 1]} : vector<1x18x18x4xbf16> to vector<1x16x16x4xbf16>
    %7 = vector.extract_strided_slice %0 {offsets = [0, 2, 0, 0], sizes = [1, 16, 16, 4], strides = [1, 1, 1, 1]} : vector<1x18x18x4xbf16> to vector<1x16x16x4xbf16>
    %8 = vector.extract_strided_slice %0 {offsets = [0, 2, 1, 0], sizes = [1, 16, 16, 4], strides = [1, 1, 1, 1]} : vector<1x18x18x4xbf16> to vector<1x16x16x4xbf16>
    %9 = vector.extract_strided_slice %0 {offsets = [0, 2, 2, 0], sizes = [1, 16, 16, 4], strides = [1, 1, 1, 1]} : vector<1x18x18x4xbf16> to vector<1x16x16x4xbf16>
    %10 = tpu.concatenate %1, %2, %3, %4, %5, %6, %7, %8, %9 in 3 : vector<1x16x16x4xbf16>, vector<1x16x16x4xbf16>, vector<1x16x16x4xbf16>, vector<1x16x16x4xbf16>, vector<1x16x16x4xbf16>, vector<1x16x16x4xbf16>, vector<1x16x16x4xbf16>, vector<1x16x16x4xbf16>, vector<1x16x16x4xbf16> -> vector<1x16x16x36xbf16>
    %11 = vector.shape_cast %10 : vector<1x16x16x36xbf16> to vector<256x36xbf16>
    %c0_3 = arith.constant 0 : index
    %c0_4 = arith.constant 0 : index
    %12 = vector.load %arg3[%c0_3, %c0_4] : memref<36x128xbf16, #tpu.memory_space<vmem>>, vector<36x128xbf16>
    %cst = arith.constant dense<0.000000e+00> : vector<256x128xf32>
    %13 = tpu.matmul %11, %12, %cst {dimension_numbers = #tpu.dot_dimension_numbers<[1], [0], [0], [1], [0, 0, 1, 1], [], []>} : vector<256x36xbf16>, vector<36x128xbf16>, vector<256x128xf32> -> vector<256x128xf32>
    %c0_5 = arith.constant 0 : index
    %c0_6 = arith.constant 0 : index
    %14 = vector.load %arg4[%c0_5, %c0_6] : memref<1x128xf32, #tpu.memory_space<vmem>>, vector<1x128xf32>
    %15 = vector.broadcast %14 : vector<1x128xf32> to vector<256x128xf32>
    %16 = arith.addf %13, %15 : vector<256x128xf32>
    %cst_7 = arith.constant 0.000000e+00 : f32
    %17 = vector.broadcast %cst_7 : f32 to vector<256x128xf32>
    %18 = arith.maximumf %16, %17 : vector<256x128xf32>
    %c0_8 = arith.constant 0 : index
    %c0_9 = arith.constant 0 : index
    %19 = vector.load %arg2[%c0_8, %c0_9] : memref<1x256xbf16, #tpu.memory_space<vmem>>, vector<1x256xbf16>
    %20 = arith.truncf %18 : vector<256x128xf32> to vector<256x128xbf16>
    %cst_10 = arith.constant dense<0.000000e+00> : vector<1x128xf32>
    %21 = tpu.matmul %19, %20, %cst_10 {dimension_numbers = #tpu.dot_dimension_numbers<[1], [0], [0], [1], [0, 0, 1, 1], [], []>} : vector<1x256xbf16>, vector<256x128xbf16>, vector<1x128xf32> -> vector<1x128xf32>
    %cst_11 = arith.constant 3.906250e-03 : f32
    %22 = vector.broadcast %cst_11 : f32 to vector<1x128xf32>
    %23 = arith.mulf %21, %22 : vector<1x128xf32>
    %24 = arith.truncf %23 : vector<1x128xf32> to vector<1x128xbf16>
    %c0_12 = arith.constant 0 : index
    %c0_13 = arith.constant 0 : index
    %25 = vector.load %arg5[%c0_12, %c0_13] : memref<128x128xbf16, #tpu.memory_space<vmem>>, vector<128x128xbf16>
    %cst_14 = arith.constant dense<0.000000e+00> : vector<1x128xf32>
    %26 = tpu.matmul %24, %25, %cst_14 {dimension_numbers = #tpu.dot_dimension_numbers<[1], [0], [0], [1], [0, 0, 1, 1], [], []>} : vector<1x128xbf16>, vector<128x128xbf16>, vector<1x128xf32> -> vector<1x128xf32>
    %c0_15 = arith.constant 0 : index
    %c0_16 = arith.constant 0 : index
    %27 = vector.load %arg6[%c0_15, %c0_16] : memref<1x128xf32, #tpu.memory_space<vmem>>, vector<1x128xf32>
    %28 = arith.addf %26, %27 : vector<1x128xf32>
    %29 = vector.shape_cast %28 : vector<1x128xf32> to vector<1x1x128xf32>
    %c0_17 = arith.constant 0 : index
    %c0_18 = arith.constant 0 : index
    %c0_19 = arith.constant 0 : index
    %30 = vector.load %arg7[%c0_17, %c0_18, %c0_19] : memref<1x1x128xf32, #tpu.memory_space<vmem>>, vector<1x1x128xf32>
    tpu.vector_store %arg7[%c0_17, %c0_18, %c0_19], %29 {strides = array<i32>} : memref<1x1x128xf32, #tpu.memory_space<vmem>>, vector<1x1x128xf32>,
    return
  }
  func.func @transform_0(%arg0: i32) -> (i32, i32, i32, i32) {
    %c0_i32 = arith.constant 0 : i32
    %c0_i32_0 = arith.constant 0 : i32
    %c0_i32_1 = arith.constant 0 : i32
    %c0_i32_2 = arith.constant 0 : i32
    return %arg0, %c0_i32, %c0_i32_0, %c0_i32_1 : i32, i32, i32, i32
  }
  func.func @transform_1(%arg0: i32) -> (i32, i32) {
    %c0_i32 = arith.constant 0 : i32
    %c0_i32_0 = arith.constant 0 : i32
    %c0_i32_1 = arith.constant 0 : i32
    return %c0_i32, %c0_i32_0 : i32, i32
  }
  func.func @transform_2(%arg0: i32) -> (i32, i32) {
    %c0_i32 = arith.constant 0 : i32
    %c0_i32_0 = arith.constant 0 : i32
    %c0_i32_1 = arith.constant 0 : i32
    return %c0_i32, %c0_i32_0 : i32, i32
  }
  func.func @transform_3(%arg0: i32) -> (i32, i32) {
    %c0_i32 = arith.constant 0 : i32
    %c0_i32_0 = arith.constant 0 : i32
    %c0_i32_1 = arith.constant 0 : i32
    return %c0_i32, %c0_i32_0 : i32, i32
  }
  func.func @transform_4(%arg0: i32) -> (i32, i32) {
    %c0_i32 = arith.constant 0 : i32
    %c0_i32_0 = arith.constant 0 : i32
    %c0_i32_1 = arith.constant 0 : i32
    return %c0_i32, %c0_i32_0 : i32, i32
  }
  func.func @transform_5(%arg0: i32) -> (i32, i32) {
    %c0_i32 = arith.constant 0 : i32
    %c0_i32_0 = arith.constant 0 : i32
    %c0_i32_1 = arith.constant 0 : i32
    return %c0_i32, %c0_i32_0 : i32, i32
  }
  func.func @transform_6(%arg0: i32) -> (i32, i32, i32) {
    %c0_i32 = arith.constant 0 : i32
    %c0_i32_0 = arith.constant 0 : i32
    %c0_i32_1 = arith.constant 0 : i32
    return %arg0, %c0_i32, %c0_i32_0 : i32, i32, i32
  }
}

</mosaic_0001>

<bundles_post_ra>
// kernel: tpu_custom_call.1
= control target key start
LH: loop header
LB: loop body
LE: loop exit
PB: predicated region body
PF: predicated region fallthrough
CT: control target
= control target key end

     0   :  { %11 = vsyncpa [#allocation3], 0  ;;  %s2785_s0 = inlined_call_operand.vmem [shape: bf16[2,18,18,4], index: 0, kind: input, shape index: {}]   ;;  %s2786_s1 = inlined_call_operand.vmem [shape: bf16[1,256], index: 1, kind: input, shape index: {}]   ;;  %s2787_s2 = inlined_call_operand.vmem [shape: bf16[36,128], index: 2, kind: input, shape index: {}]   ;;  %s2788_s3 = inlined_call_operand.vmem [shape: f32[1,128], index: 3, kind: input, shape index: {}]   ;;  %s2789_s4 = inlined_call_operand.vmem [shape: bf16[128,128], index: 4, kind: input, shape index: {}]   ;;  %s2790_s5 = inlined_call_operand.vmem [shape: f32[1,128], index: 5, kind: input, shape index: {}]   ;;  %s2791_s6 = inlined_call_operand.hbm [shape: f32[2,1,128], index: 6, kind: output, shape index: {}]  }
   0x1   :  { %13 = vsyncpa [#allocation3 + $0x1], 0  ;;  %s1947_s21 = smov 0   ;;  %s1949_s22 = smov 0  }
   0x2   :  { %s1951_s23 = smov 0   ;;  %s1953_s24 = smov 0  }
   0x3 LB: > { %s1968_s25 = sadd.s32 4294967295, %s1902_s24   ;;  %s1620_s26 = sadd.s32 4294967294, %s1902_s24   ;;  %s1902_s24 = sphi %s1953_s24, %s2797_s24   ;;  %s1898_s23 = sphi %s1951_s23, %s2796_s23   ;;  %s1894_s22 = sphi %s1949_s22, %s2795_s22   ;;  %s1890_s21 = sphi %s1947_s21, %s2794_s21  }
   0x4   : > { %s1972_s27 = sadd.s32 1, %s1902_s24   ;;  %s157_s28 = sadd.s32 1, %s1898_s23 }
   0x5   : > { %s154_s29 = ssub.s32 %s1902_s24, %s1972_s27  ;;  %p167_p0 = scmp.ne.s32.totalorder %s1898_s23, %s1894_s22 }
   0x6   : > { %p155_p1 = scmp.eq.s32.totalorder %s154_s29, 0  ;;  %p168_p2 = scmp.eq.s32.totalorder %s1968_s25, 1 }
   0x7   : > { %p173_p3 = scmp.ne.s32.totalorder %s1894_s22, %s1890_s21  ;;  %p174_p4 = scmp.eq.s32.totalorder %s1620_s26, 1 }
   0x8   : > { %s1983_s30 = scalar_select %p155_p1, %s1898_s23, %s157_s28  }
   0x9   : > { %p1985_p5 = por %p168_p2, %p167_p0  ;;  %p1989_p6 = por %p174_p4, %p173_p3 }
   0xa   : > { %p1623_p7 = scmp.ge.s32.totalorder %s1902_s24, 1  ;;  %p215_p8 = scmp.lt.s32.totalorder %s1902_s24, 3 }
   0xc   : > { %p216_p9 = pnand %p1623_p7, %p215_p8 }
   0xd   : > { %p244_p10 = scmp.lt.s32.totalorder (!%p216_p9), %s1968_s25, 1  ;;  %s1904_s14 = smov (!%p216_p9), 12  }
   0xe   : > { %219 = sbr.rel (%p216_p9) target bundleno = 914 (0x392), region = 44  ;;  %s1905_s15 = smov (!%p216_p9), 8  }
   0xf   : > { %s1906_s16 = smov (!%p216_p9), 24   ;;  %s1907_s17 = smov (!%p216_p9), 20  }
  0x10   : > { %s1908_s18 = smov (!%p216_p9), 16   ;;  %s1909_s19 = smov (!%p216_p9), 4  }
  0x11   : > { %s1910_s20 = smov (!%p216_p9), 28   ;;  %s1911_s26 = smov (!%p216_p9), 32  }
  0x13   : > { %s245_s9 = scalar_select %p244_p10, %s1968_s25, 1  ;;  %vm657_vm0 = vcmask 1046528   ;;  %vm432_vm1 = vsmask.f32 7424  ;;  %vm1297_vm2 = vcmask 1041408   ;;  %vm976_vm3 = vcmask 31744  }
  0x14   : > { %vm1009_vm4 = vcmask 64512   ;;  %vm1075_vm5 = vcmask 130048   ;;  %vm1042_vm6 = vcmask 97280   ;;  %vm1108_vm7 = vcmask 162816  }
  0x15   : > { %s1789_s10 = smul.u32 216, %s245_s9  ;;  %vm1141_vm8 = vcmask 195584   ;;  %vm1174_vm9 = vcmask 228352   ;;  %vm1207_vm10 = vcmask 261120   ;;  %vm1264_vm11 = vcmask 293888  }
  0x17   : > { %s2000_s13 = scalar_lea.vmem %s2785_s0, %s1789_s10 }
  0x18   : > { %v2003_v0 = vld [vmem:[%s2000_s13 + $0x90] sm:$0xff]  ;;  %v2006_v1 = vld [vmem:[%s2000_s13 + $0x84] sm:$0xff]  ;;  %v285_v2 = vld [vmem:[%s2000_s13 + $0x8c] sm:$0x1] }
  0x19   : > { %v411_v3 = vunpack.c.l.b16 %v285_v2  ;;  %v252_v4 = vld [vmem:[%s2000_s13 + $0x8] sm:$0x1]  ;;  %765 = vrot.lane.b32.xlu1 %v2003_v0, %s1904_s14  ;;  %v288_v6 = vld [vmem:[%s2000_s13 + $0x98] sm:$0x1]  ;;  %v691_v8 = vrot.slane %v2006_v1, 1  ;;  %v580_v10 = vshll.u32 %v2003_v0, 16 }
  0x1a   : > { %v400_v5 = vunpack.c.l.b16 %v252_v4  ;;  %v412_v9 = vunpack.c.l.b16 %v288_v6  ;;  %v255_v11 = vld [vmem:[%s2000_s13 + $0x14] sm:$0x1]  ;;  %v2017_v13 = vld [vmem:[%s2000_s13] sm:$0xff]  ;;  %v694_v16 = vrot.slane %v2003_v0, 1  ;;  %v578_v18 = vshrl.u32 %v2003_v0, 16  ;;  %v2025_v19 = vld [vmem:[%s2000_s13 + $0xc] sm:$0xff] }
  0x1b   : > { %v427_v7 = vpack.c.b16 %v411_v3, %v411_v3  ;;  %v2021_v17 = vld [vmem:[%s2000_s13 + $0x9c] sm:$0xff]  ;;  %v401_v20 = vunpack.c.l.b16 %v255_v11  ;;  %v582_v22 = vrot.slane %v580_v10, 1  ;;  %v658_v25 = vrot.slane %v2017_v13, 1  ;;  %v291_v31 = vld [vmem:[%s2000_s13 + $0xa4] sm:$0x1] }
  0x1c   : > { %v416_v14 = vpack.c.b16 %v400_v5, %v400_v5  ;;  %v428_v15 = vpack.c.b16 %v412_v9, %v412_v9  ;;  %v568_v28 = vshll.u32 %v2006_v1, 16  ;;  %v448_v30 = vshll.u32 %v2025_v19, 16  ;;  %v258_v59 = vld [vmem:[%s2000_s13 + $0x20] sm:$0x1]  ;;  %v2070_v2 = vld [vmem:[%s2000_s13 + $0x18] sm:$0xff] }
  0x1d   : > { %v692_v12 = vrot.slane %v427_v7, 1  ;;  %v2041_v29 = vpack.c.b16 %v401_v20, %v401_v20  ;;  %v583_v32 = vor.u32 %v582_v22, %v578_v18  ;;  %v566_v34 = vshrl.u32 %v2006_v1, 16 }
  0x1e   : > { %v585_v23 = vshll.u32 %v428_v15, 16  ;;  %v695_v24 = vrot.slane %v428_v15, 1  ;;  %v659_v26 = vrot.slane %v416_v14, 1  ;;  %v573_v35 = vshll.u32 %v427_v7, 16 }
  0x1f   : > { %v2028_v21 = vsel %vm657_vm0, %v691_v8, %v692_v12  ;;  %v570_v37 = vrot.slane %v568_v28, 1  ;;  %v413_v38 = vunpack.c.l.b16 %v291_v31  ;;  %v436_v39 = vshll.u32 %v2017_v13, 16  ;;  %v2106_v28 = vld [vmem:[%s2000_s13 + $0xa8] sm:$0xff] }
  0x20   : > { %728 = vrot.lane.b32.xlu0 %v2028_v21, %s1905_s15  ;;  %v2034_v27 = vsel %vm657_vm0, %v694_v16, %v695_v24  ;;  %v587_v33 = vrot.slane %v585_v23, 1  ;;  %v660_v36 = vsel %vm657_vm0, %v658_v25, %v659_v26  ;;  %v446_v40 = vshrl.u32 %v2025_v19, 16  ;;  %v294_v25 = vld [vmem:[%s2000_s13 + $0xb0] sm:$0x1] }
  0x21   : > { %884 = vrot.lane.b32.xlu1 %v2021_v17, %s1906_s16  ;;  %847 = vrot.lane.b32.xlu2 %v2034_v27, %s1907_s17  ;;  %v450_v41 = vrot.slane %v448_v30, 1  ;;  %v453_v42 = vshll.u32 %v2041_v29, 16  ;;  %v434_v44 = vshrl.u32 %v2017_v13, 16  ;;  %v438_v45 = vrot.slane %v436_v39, 1  ;;  %v2125_v39 = vld [vmem:[%s2000_s13 + $0x24] sm:$0xff] }
  0x22   : > { %v2051_v43 = vsel %vm432_vm1, %v583_v32, %v587_v33  ;;  %v441_v46 = vshll.u32 %v416_v14, 16  ;;  %v571_v47 = vor.u32 %v570_v37, %v566_v34  ;;  %v575_v48 = vrot.slane %v573_v35, 1  ;;  %v261_v37 = vld [vmem:[%s2000_s13 + $0x2c] sm:$0x1] }
  0x23   : > { %v429_v49 = vpack.c.b16 %v413_v38, %v413_v38  ;;  %v592_v50 = vshll.u32 %v2021_v17, 16  ;;  %v451_v51 = vor.u32 %v450_v41, %v446_v40  ;;  %v455_v52 = vrot.slane %v453_v42, 1  ;;  %v270_v41 = vld [vmem:[%s2000_s13 + $0x50] sm:$0x1] }
  0x24   : > { %v439_v53 = vor.u32 %v438_v45, %v434_v44  ;;  %v443_v54 = vrot.slane %v441_v46, 1  ;;  %v2061_v55 = vsel %vm432_vm1, %v571_v47, %v575_v48  ;;  %v590_v56 = vshrl.u32 %v2021_v17, 16  ;;  %v2136_v45 = vld [vmem:[%s2000_s13 + $0x48] sm:$0xff] }
  0x25   : > { %v594_v57 = vrot.slane %v592_v50, 1  ;;  %v597_v58 = vshll.u32 %v429_v49, 16  ;;  %v456_v60 = vsel %vm432_vm1, %v451_v51, %v455_v52  ;;  %v402_v3 = vunpack.c.l.b16 %v258_v59 }
  0x26   : > { %v444_v61 = vsel %vm432_vm1, %v439_v53, %v443_v54  ;;  %v697_v4 = vrot.slane %v2021_v17, 1  ;;  %v698_v5 = vrot.slane %v429_v49, 1  ;;  %v460_v6 = vshll.u32 %v2070_v2, 16 }
  0x27   : > { %v595_v62 = vor.u32 %v594_v57, %v590_v56  ;;  %v599_v63 = vrot.slane %v597_v58, 1  ;;  %v418_v8 = vpack.c.b16 %v402_v3, %v402_v3  ;;  %v458_v10 = vshrl.u32 %v2070_v2, 16 }
  0x28   : > { %706 = vrot.lane.b32.xlu0 %v660_v36, %s1905_s15  ;;  %v2080_v9 = vsel %vm657_vm0, %v697_v4, %v698_v5  ;;  %v462_v11 = vrot.slane %v460_v6, 1  ;;  %v661_v14 = vrot.slane %v2025_v19, 1  ;;  %v662_v15 = vrot.slane %v2041_v29, 1  ;;  %v2158_v4 = vld [vmem:[%s2000_s13 + $0x54] sm:$0xff] }
  0x29   : > { %812 = vrot.lane.b32.xlu1 %v2051_v43, %s1908_s18  ;;  %743 = vrot.lane.b32.xlu2 %v2025_v19, %s1904_s14  ;;  %v2077_v7 = vsel %vm432_vm1, %v595_v62, %v599_v63  ;;  %v465_v12 = vshll.u32 %v418_v8, 16  ;;  %v664_v23 = vrot.slane %v2070_v2, 1  ;;  %v665_v24 = vrot.slane %v418_v8, 1 }
  0x2a   : > { %v463_v16 = vor.u32 %v462_v11, %v458_v10  ;;  %v663_v20 = vsel %vm657_vm0, %v661_v14, %v662_v15  ;;  %v414_v29 = vunpack.c.l.b16 %v294_v25  ;;  %v604_v31 = vshll.u32 %v2106_v28, 16 }
  0x2b   : > { %v467_v18 = vrot.slane %v465_v12, 1  ;;  %v2103_v26 = vsel %vm657_vm0, %v664_v23, %v665_v24  ;;  %v602_v32 = vshrl.u32 %v2106_v28, 16  ;;  %v403_v40 = vunpack.c.l.b16 %v261_v37  ;;  %v276_v24 = vld [vmem:[%s2000_s13 + $0x68] sm:$0x1] }
  0x2c   : > { %v430_v30 = vpack.c.b16 %v414_v29, %v414_v29  ;;  %v606_v33 = vrot.slane %v604_v31, 1  ;;  %v472_v44 = vshll.u32 %v2125_v39, 16  ;;  %v406_v46 = vunpack.c.l.b16 %v270_v41 }
  0x2d   : > { %v2093_v22 = vsel %vm432_vm1, %v463_v16, %v467_v18  ;;  %v419_v42 = vpack.c.b16 %v403_v40, %v403_v40  ;;  %v470_v47 = vshrl.u32 %v2125_v39, 16  ;;  %v700_v50 = vrot.slane %v2106_v28, 1 }
  0x2e   : > { %v609_v34 = vshll.u32 %v430_v30, 16  ;;  %v607_v35 = vor.u32 %v606_v33, %v602_v32  ;;  %v474_v48 = vrot.slane %v472_v44, 1  ;;  %v701_v51 = vrot.slane %v430_v30, 1  ;;  %v2185_v32 = vld [vmem:[%s2000_s13 + $0x60] sm:$0xff] }
  0x2f   : > { %v477_v49 = vshll.u32 %v419_v42, 16  ;;  %v422_v52 = vpack.c.b16 %v406_v46, %v406_v46  ;;  %v508_v53 = vshll.u32 %v2136_v45, 16  ;;  %v506_v58 = vshrl.u32 %v2136_v45, 16 }
  0x30   : > { %647 = vrot.lane.b32.xlu0 %v2061_v55, %s1909_s19  ;;  %v611_v36 = vrot.slane %v609_v34, 1  ;;  %v475_v54 = vor.u32 %v474_v48, %v470_v47  ;;  %v2148_v57 = vsel %vm657_vm0, %v700_v50, %v701_v51  ;;  %v676_v6 = vrot.slane %v2136_v45, 1 }
  0x31   : > { %790 = vrot.lane.b32.xlu1 %v456_v60, %s1908_s18  ;;  %625 = vrot.lane.b32.xlu2 %v444_v61, %s1909_s19  ;;  %v479_v56 = vrot.slane %v477_v49, 1  ;;  %v510_v59 = vrot.slane %v508_v53, 1  ;;  %v273_v61 = vld [vmem:[%s2000_s13 + $0x5c] sm:$0x1]  ;;  %v677_v8 = vrot.slane %v422_v52, 1  ;;  %v520_v10 = vshll.u32 %v2158_v4, 16 }
  0x32   : > { %v2122_v38 = vsel %vm432_vm1, %v607_v35, %v611_v36  ;;  %v407_v5 = vunpack.c.l.b16 %v273_v61  ;;  %v518_v15 = vshrl.u32 %v2158_v4, 16  ;;  %v668_v23 = vrot.slane %v419_v42, 1  ;;  %v1244_v42 = vld [vmem:[%s2787_s2 + $0x10] sm:$0x3] }
  0x33   : > { %v2153_v62 = vsel %vm432_vm1, %v475_v54, %v479_v56  ;;  %v511_v63 = vor.u32 %v510_v59, %v506_v58  ;;  %v2170_v14 = vsel %vm657_vm0, %v676_v6, %v677_v8  ;;  %v522_v16 = vrot.slane %v520_v10, 1  ;;  %v297_v58 = vld [vmem:[%s2000_s13 + $0xbc] sm:$0x1]  ;;  %v1774_v59 = vld [vmem:[%s2787_s2 + $0x8] sm:$0xff] }
  0x34   : > { %v423_v12 = vpack.c.b16 %v407_v5, %v407_v5  ;;  %v408_v31 = vunpack.c.l.b16 %v276_v24  ;;  %v679_v34 = vrot.slane %v2158_v4, 1  ;;  %v532_v37 = vshll.u32 %v2185_v32, 16 }
  0x35   : > { %v523_v25 = vor.u32 %v522_v16, %v518_v15  ;;  %v530_v44 = vshrl.u32 %v2185_v32, 16  ;;  %v1258_v48 = vunpack.c.l.b16 %v1244_v42  ;;  %v682_v53 = vrot.slane %v2185_v32, 1 }
  0x36   : > { %v525_v18 = vshll.u32 %v423_v12, 16  ;;  %v680_v35 = vrot.slane %v423_v12, 1  ;;  %v424_v36 = vpack.c.b16 %v408_v31, %v408_v31  ;;  %v534_v46 = vrot.slane %v532_v37, 1  ;;  %v2251_v31 = vld [vmem:[%s2000_s13 + $0x30] sm:$0xff] }
  0x37   : > { %v1261_v49 = vpack.c.b16 %v1258_v48, %v1258_v48  ;;  %v415_v61 = vunpack.c.l.b16 %v297_v58  ;;  %v482_v42 = vshrl.u32 %v2251_v31, 16 }
  0x38   : > { %931 = vrot.lane.b32.xlu0 %v2077_v7, %s1910_s20  ;;  %v527_v29 = vrot.slane %v525_v18, 1  ;;  %v2199_v40 = vsel %vm657_vm0, %v679_v34, %v680_v35  ;;  %v537_v47 = vshll.u32 %v424_v36, 16  ;;  %v535_v50 = vor.u32 %v534_v46, %v530_v44 }
  0x39   : > { %862 = vrot.lane.b32.xlu1 %v2070_v2, %s1906_s16  ;;  %966 = vrot.lane.b32.xlu2 %v2080_v9, %s1911_s26  ;;  %v683_v54 = vrot.slane %v424_v36, 1 }
  0x3a   : > { %v2188_v33 = vsel %vm432_vm1, %v523_v25, %v527_v29  ;;  %v539_v51 = vrot.slane %v537_v47, 1  ;;  %v264_v25 = vld [vmem:[%s2000_s13 + $0x38] sm:$0x1] }
  0x3b   : > { %v404_v34 = vunpack.c.l.b16 %v264_v25 }
  0x40   : > { %825 = vrot.lane.b32.xlu0 %v663_v20, %s1907_s17 }
  0x41   : > { %649 = vrot.lane.b32.xlu1 %v2051_v43, %s1909_s19  ;;  %909 = vrot.lane.b32.xlu2 %v2093_v22, %s1910_s20 }
  0x48   : > { %944 = vrot.lane.b32.xlu0 %v2103_v26, %s1911_s26 }
  0x49   : > { %814 = vrot.lane.b32.xlu1 %v2077_v7, %s1908_s18  ;;  %730 = vrot.lane.b32.xlu2 %v2034_v27, %s1905_s15 }
  0x50   : > { %767 = vrot.lane.b32.xlu0 %v2021_v17, %s1904_s14 }
  0x51   : > { %708 = vrot.lane.b32.xlu1 %v663_v20, %s1905_s15  ;;  %627 = vrot.lane.b32.xlu2 %v456_v60, %s1909_s19  ;;  %v513_v60 = vshll.u32 %v422_v52, 16  ;;  %v667_v20 = vrot.slane %v2125_v39, 1  ;;  %v1299_v52 = vsel %vm1297_vm2, %v1261_v49, 0 }
  0x52   : > { %1784 = vmatpush.bf16.msra.mxu2 %v1299_v52  ;;  %1306 = vmatpush.bf16.msra.mxu0 %v1299_v52 }
  0x53   : > { %v515_v3 = vrot.slane %v513_v60, 1  ;;  %v2182_v30 = vsel %vm657_vm0, %v667_v20, %v668_v23  ;;  %1783 = vmatpush.bf16.msra.mxu1 %v1299_v52  ;;  %v2221_v60 = vsel %vm432_vm1, %v535_v50, %v539_v51 }
  0x55   : > { %v2167_v11 = vsel %vm432_vm1, %v511_v63, %v515_v3  ;;  %v1773_v63 = vld [vmem:[%s2787_s2] sm:$0xff]  ;;  %v431_v3 = vpack.c.b16 %v415_v61, %v415_v61 }
  0x56   : > { %1786 = vmatpush.bf16.msra.mxu2 %v1774_v59  ;;  %1307 = vmatpush.bf16.msra.mxu0 %v1774_v59 }
  0x57   : > { %1785 = vmatpush.bf16.msra.mxu1 %v1774_v59  ;;  %v621_v15 = vshll.u32 %v431_v3, 16  ;;  %v704_v48 = vrot.slane %v431_v3, 1 }
  0x58   : > { %849 = vrot.lane.b32.xlu0 %v2080_v9, %s1907_s17 }
  0x59   : > { %933 = vrot.lane.b32.xlu1 %v2122_v38, %s1910_s20  ;;  %886 = vrot.lane.b32.xlu2 %v2106_v28, %s1906_s16  ;;  %v623_v20 = vrot.slane %v621_v15, 1 }
  0x5a   : > { %1788 = vmatpush.bf16.msra.mxu2 %v1773_v63  ;;  %1308 = vmatpush.bf16.msra.mxu0 %v1773_v63 }
  0x5b   : > { %1787 = vmatpush.bf16.msra.mxu1 %v1773_v63 }
  0x60   : > { %745 = vrot.lane.b32.xlu0 %v2070_v2, %s1904_s14 }
  0x61   : > { %827 = vrot.lane.b32.xlu1 %v2103_v26, %s1907_s17  ;;  %792 = vrot.lane.b32.xlu2 %v2093_v22, %s1908_s18 }
  0x68   : > { %968 = vrot.lane.b32.xlu0 %v2148_v57, %s1911_s26 }
  0x69   : > { %911 = vrot.lane.b32.xlu1 %v2153_v62, %s1910_s20  ;;  %864 = vrot.lane.b32.xlu2 %v2125_v39, %s1906_s16 }
  0x70   : > { %637 = vrot.lane.b32.xlu0 %v2167_v11, %s1909_s19 }
  0x71   : > { %755 = vrot.lane.b32.xlu1 %v2158_v4, %s1904_s14  ;;  %718 = vrot.lane.b32.xlu2 %v2170_v14, %s1905_s15 }
  0x78   : > { %946 = vrot.lane.b32.xlu0 %v2182_v30, %s1911_s26 }
  0x79   : > { %874 = vrot.lane.b32.xlu1 %v2185_v32, %s1906_s16  ;;  %802 = vrot.lane.b32.xlu2 %v2188_v33, %s1908_s18 }
  0x7b   : > { %v2201_v41 = vpop.permute.xlu2 %847 }
  0x80   : > { %837 = vrot.lane.b32.xlu0 %v2199_v40, %s1907_s17 }
  0x81   : > { %732 = vrot.lane.b32.xlu1 %v2080_v9, %s1905_s15  ;;  %651 = vrot.lane.b32.xlu2 %v2077_v7, %s1909_s19  ;;  %v2224_v9 = vld [vmem:[%s2000_s13 + $0xb4] sm:$0xff]  ;;  %v2227_v7 = vsel %vm657_vm0, %v682_v53, %v683_v54 }
  0x82   : > { %v616_v5 = vshll.u32 %v2224_v9, 16  ;;  %v614_v10 = vshrl.u32 %v2224_v9, 16  ;;  %v703_v47 = vrot.slane %v2224_v9, 1 }
  0x83   : > { %v2214_v56 = vpop.permute.xlu2 %743 }
  0x84   : > { %v618_v12 = vrot.slane %v616_v5, 1  ;;  %v2277_v61 = vsel %vm657_vm0, %v703_v47, %v704_v48 }
  0x86   : > { %v619_v18 = vor.u32 %v618_v12, %v614_v10 }
  0x88   : > { %921 = vrot.lane.b32.xlu0 %v2221_v60, %s1910_s20  ;;  %v2248_v29 = vsel %vm432_vm1, %v619_v18, %v623_v20  ;;  %v670_v20 = vrot.slane %v2251_v31, 1 }
  0x89   : > { %816 = vrot.lane.b32.xlu1 %v2122_v38, %s1908_s18  ;;  %956 = vrot.lane.b32.xlu2 %v2227_v7, %s1911_s26 }
  0x8b   : > { %v766_v6 = vpop.permute.xlu1 %765  ;;  %v626_v8 = vpop.permute.xlu2 %625 }
  0x8c   : > { %v978_v10 = vsel %vm976_vm3, %v2017_v13, %v626_v8  ;;  %v279_v8 = vld [vmem:[%s2000_s13 + $0x74] sm:$0x1] }
  0x90   : > { %769 = vrot.lane.b32.xlu0 %v2106_v28, %s1904_s14 }
  0x91   : > { %710 = vrot.lane.b32.xlu1 %v2103_v26, %s1905_s15  ;;  %629 = vrot.lane.b32.xlu2 %v2093_v22, %s1909_s19  ;;  %v420_v22 = vpack.c.b16 %v404_v34, %v404_v34  ;;  %v484_v26 = vshll.u32 %v2251_v31, 16 }
  0x92   : > { %v729_v16 = vpop.permute.xlu0 %728 }
  0x93   : > { %v885_v23 = vpop.permute.xlu1 %884  ;;  %v967_v24 = vpop.permute.xlu2 %966  ;;  %v486_v44 = vrot.slane %v484_v26, 1  ;;  %v489_v46 = vshll.u32 %v420_v22, 16 }
  0x95   : > { %v487_v51 = vor.u32 %v486_v44, %v482_v42  ;;  %v491_v52 = vrot.slane %v489_v46, 1  ;;  %v2316_v42 = vld [vmem:[%s2000_s13 + $0x6c] sm:$0xff] }
  0x96   : > { %v544_v46 = vshll.u32 %v2316_v42, 16 }
  0x97   : > { %v2283_v3 = vsel %vm432_vm1, %v487_v51, %v491_v52  ;;  %v542_v52 = vshrl.u32 %v2316_v42, 16 }
  0x98   : > { %851 = vrot.lane.b32.xlu0 %v2148_v57, %s1907_s17 }
  0x99   : > { %935 = vrot.lane.b32.xlu1 %v2248_v29, %s1910_s20  ;;  %888 = vrot.lane.b32.xlu2 %v2224_v9, %s1906_s16 }
  0x9a   : > { %v707_v35 = vpop.permute.xlu0 %706 }
  0x9b   : > { %v813_v36 = vpop.permute.xlu1 %812  ;;  %v2260_v37 = vpop.permute.xlu2 %909  ;;  %v1011_v18 = vsel %vm1009_vm4, %v978_v10, %v707_v35  ;;  %v300_v10 = vld [vmem:[%s2000_s13 + $0xc8] sm:$0x1] }
  0x9c   : > { %v1044_v25 = vsel %vm1042_vm6, %v1011_v18, %v2214_v56  ;;  %v776_v18 = vunpack.c.l.b16 %v300_v10 }
  0xa0   : > { %747 = vrot.lane.b32.xlu0 %v2125_v39, %s1904_s14 }
  0xa1   : > { %829 = vrot.lane.b32.xlu1 %v2182_v30, %s1907_s17  ;;  %794 = vrot.lane.b32.xlu2 %v2153_v62, %s1908_s18 }
  0xa2   : > { %v648_v49 = vpop.permute.xlu0 %647 }
  0xa3   : > { %v1000_v50 = vsel %vm976_vm3, %v2006_v1, %v648_v49  ;;  %v791_v54 = vpop.permute.xlu1 %790  ;;  %v2273_v58 = vpop.permute.xlu2 %730 }
  0xa4   : > { %v1033_v53 = vsel %vm1009_vm4, %v1000_v50, %v729_v16 }
  0xa5   : > { %v1066_v59 = vsel %vm1042_vm6, %v1033_v53, %v766_v6  ;;  %v546_v53 = vrot.slane %v544_v46, 1 }
  0xa6   : > { %v1099_v63 = vsel %vm1075_vm5, %v1066_v59, %v813_v36 }
  0xa7   : > { %v1132_v1 = vsel %vm1108_vm7, %v1099_v63, %v2201_v41 }
  0xa8   : > { %970 = vrot.lane.b32.xlu0 %v2277_v61, %s1911_s26  ;;  %v1165_v5 = vsel %vm1141_vm8, %v1132_v1, %v885_v23  ;;  %v671_v23 = vrot.slane %v420_v22, 1  ;;  %v409_v22 = vunpack.c.l.b16 %v279_v8  ;;  %v685_v1 = vrot.slane %v2316_v42, 1 }
  0xa9   : > { %913 = vrot.lane.b32.xlu1 %v2283_v3, %s1910_s20  ;;  %866 = vrot.lane.b32.xlu2 %v2251_v31, %s1906_s16 }
  0xaa   : > { %v932_v6 = vpop.permute.xlu0 %931  ;;  %v2313_v36 = vsel %vm657_vm0, %v670_v20, %v671_v23  ;;  %v425_v44 = vpack.c.b16 %v409_v22, %v409_v22 }
  0xab   : > { %v1198_v41 = vsel %vm1174_vm9, %v1165_v5, %v932_v6  ;;  %v863_v12 = vpop.permute.xlu1 %862  ;;  %v2296_v16 = vpop.permute.xlu2 %627 }
  0xac   : > { %v1231_v15 = vsel %vm1207_vm10, %v1198_v41, %v967_v24  ;;  %v1077_v24 = vsel %vm1075_vm5, %v1044_v25, %v791_v54  ;;  %v549_v54 = vshll.u32 %v425_v44, 16  ;;  %v686_v5 = vrot.slane %v425_v44, 1 }
  0xad   : > { %1716 = vmatmul.msk.bf16.vlgmr.msra.gmra.mxu2 %vm1264_vm11, %v1231_v15  ;;  %v2347_v15 = vld [vmem:[%s2000_s13 + $0xc0] sm:$0xff] }
  0xae   : > { %v551_v59 = vrot.slane %v549_v54, 1  ;;  %v2350_v20 = vsel %vm657_vm0, %v685_v1, %v686_v5  ;;  %v781_v23 = vshll.u32 %v2347_v15, 16  ;;  %v980_v1 = vsel %vm976_vm3, %v2025_v19, %v2296_v16 }
  0xb0   : > { %639 = vrot.lane.b32.xlu0 %v2188_v33, %s1909_s19  ;;  %v783_v22 = vrot.slane %v781_v23, 1 }
  0xb1   : > { %757 = vrot.lane.b32.xlu1 %v2185_v32, %s1904_s14  ;;  %720 = vrot.lane.b32.xlu2 %v2199_v40, %s1905_s15 }
  0xb2   : > { %v826_v13 = vpop.permute.xlu0 %825 }
  0xb3   : > { %v1110_v34 = vsel %vm1108_vm7, %v1077_v24, %v826_v13  ;;  %v650_v35 = vpop.permute.xlu1 %649  ;;  %v887_v26 = vpop.permute.xlu2 %886 }
  0xb4   : > { %v1143_v56 = vsel %vm1141_vm8, %v1110_v34, %v863_v12  ;;  %v1002_v25 = vsel %vm976_vm3, %v2003_v0, %v650_v35  ;;  %v779_v34 = vshrl.u32 %v2347_v15, 16 }
  0xb5   : > { %v1176_v48 = vsel %vm1174_vm9, %v1143_v56, %v2260_v37  ;;  %v547_v37 = vor.u32 %v546_v53, %v542_v52  ;;  %v1035_v24 = vsel %vm1009_vm4, %v1002_v25, %v2273_v58  ;;  %v267_v52 = vld [vmem:[%s2000_s13 + $0x44] sm:$0x1] }
  0xb6   : > { %v784_v58 = vor.u32 %v783_v22, %v779_v34 }
  0xb7   : > { %v2344_v12 = vsel %vm432_vm1, %v547_v37, %v551_v59  ;;  %v2381_v37 = vld [vmem:[%s2000_s13 + $0x3c] sm:$0xff] }
  0xb8   : > { %948 = vrot.lane.b32.xlu0 %v2313_v36, %s1911_s26 }
  0xb9   : > { %876 = vrot.lane.b32.xlu1 %v2316_v42, %s1906_s16  ;;  %804 = vrot.lane.b32.xlu2 %v2221_v60, %s1908_s18 }
  0xba   : > { %v945_v47 = vpop.permute.xlu0 %944 }
  0xbb   : > { %v1209_v49 = vsel %vm1207_vm10, %v1176_v48, %v945_v47  ;;  %v815_v50 = vpop.permute.xlu1 %814  ;;  %v2330_v51 = vpop.permute.xlu2 %792 }
  0xbc   : > { %1705 = vmatmul.msk.bf16.vlgmr.msra.gmra.mxu0 %vm1264_vm11, %v1209_v49 }
  0xc0   : > { %839 = vrot.lane.b32.xlu0 %v2227_v7, %s1907_s17 }
  0xc1   : > { %734 = vrot.lane.b32.xlu1 %v2148_v57, %s1905_s15  ;;  %653 = vrot.lane.b32.xlu2 %v2122_v38, %s1909_s19  ;;  %v777_v57 = vpack.c.b16 %v776_v18, %v776_v18 }
  0xc2   : > { %v768_v63 = vpop.permute.xlu0 %767 }
  0xc3   : > { %v709_v6 = vpop.permute.xlu1 %708  ;;  %v2340_v41 = vpop.permute.xlu2 %864  ;;  %v786_v56 = vshll.u32 %v777_v57, 16  ;;  %v1068_v44 = vsel %vm1042_vm6, %v1035_v24, %v768_v63  ;;  %v496_v63 = vshll.u32 %v2381_v37, 16  ;;  %v822_v24 = vrot.slane %v2347_v15, 1 }
  0xc4   : > { %v1101_v0 = vsel %vm1075_vm5, %v1068_v44, %v815_v50  ;;  %v1013_v18 = vsel %vm1009_vm4, %v980_v1, %v709_v6  ;;  %v823_v34 = vrot.slane %v777_v57, 1 }
  0xc5   : > { %v788_v35 = vrot.slane %v786_v56, 1  ;;  %v498_v23 = vrot.slane %v496_v63, 1 }
  0xc7   : > { %v2378_v54 = vsel %vm432_vm1, %v784_v58, %v788_v35 }
  0xc8   : > { %923 = vrot.lane.b32.xlu0 %v2344_v12, %s1910_s20 }
  0xc9   : > { %818 = vrot.lane.b32.xlu1 %v2248_v29, %s1908_s18  ;;  %958 = vrot.lane.b32.xlu2 %v2350_v20, %s1911_s26 }
  0xca   : > { %v850_v38 = vpop.permute.xlu0 %849 }
  0xcb   : > { %v934_v13 = vpop.permute.xlu1 %933  ;;  %v2361_v8 = vpop.permute.xlu2 %718  ;;  %v1134_v47 = vsel %vm1108_vm7, %v1101_v0, %v850_v38  ;;  %v494_v38 = vshrl.u32 %v2381_v37, 16 }
  0xcc   : > { %v1167_v53 = vsel %vm1141_vm8, %v1134_v47, %v887_v26 }
  0xcd   : > { %v499_v6 = vor.u32 %v498_v23, %v494_v38  ;;  %v2448_v38 = vld [vmem:[%s2000_s13 + $0x78] sm:$0xff] }
  0xd0   : > { %771 = vrot.lane.b32.xlu0 %v2224_v9, %s1904_s14 }
  0xd1   : > { %712 = vrot.lane.b32.xlu1 %v2182_v30, %s1905_s15  ;;  %631 = vrot.lane.b32.xlu2 %v2153_v62, %s1909_s19  ;;  %v405_v30 = vunpack.c.l.b16 %v267_v52  ;;  %v1200_v62 = vsel %vm1174_vm9, %v1167_v53, %v934_v13 }
  0xd2   : > { %v746_v46 = vpop.permute.xlu0 %745 }
  0xd3   : > { %v828_v48 = vpop.permute.xlu1 %827  ;;  %v803_v49 = vpop.permute.xlu2 %802  ;;  %v421_v59 = vpack.c.b16 %v405_v30, %v405_v30  ;;  %v1046_v13 = vsel %vm1042_vm6, %v1013_v18, %v746_v46  ;;  %v2411_v46 = vsel %vm657_vm0, %v822_v24, %v823_v34  ;;  %v673_v30 = vrot.slane %v2381_v37, 1 }
  0xd4   : > { %v1079_v16 = vsel %vm1075_vm5, %v1046_v13, %v2330_v51 }
  0xd5   : > { %v501_v25 = vshll.u32 %v421_v59, 16  ;;  %v1112_v0 = vsel %vm1108_vm7, %v1079_v16, %v828_v48  ;;  %v554_v16 = vshrl.u32 %v2448_v38, 16 }
  0xd6   : > { %v1145_v58 = vsel %vm1141_vm8, %v1112_v0, %v2340_v41 }
  0xd7   : > { %v503_v22 = vrot.slane %v501_v25, 1 }
  0xd8   : > { %853 = vrot.lane.b32.xlu0 %v2277_v61, %s1907_s17 }
  0xd9   : > { %937 = vrot.lane.b32.xlu1 %v2378_v54, %s1910_s20  ;;  %890 = vrot.lane.b32.xlu2 %v2347_v15, %s1906_s16  ;;  %v2415_v57 = vsel %vm432_vm1, %v499_v6, %v503_v22 }
  0xda   : > { %v969_v50 = vpop.permute.xlu0 %968 }
  0xdb   : > { %v1233_v26 = vsel %vm1207_vm10, %v1200_v62, %v969_v50  ;;  %v912_v5 = vpop.permute.xlu1 %911  ;;  %v2396_v10 = vpop.permute.xlu2 %651  ;;  %v674_v62 = vrot.slane %v421_v59, 1 }
  0xdc   : > { %1717 = vmatmul.msk.bf16.gmra.mxu2 %vm1264_vm11, %v1233_v26  ;;  %v1178_v51 = vsel %vm1174_vm9, %v1145_v58, %v912_v5  ;;  %v282_v26 = vld [vmem:[%s2000_s13 + $0x80] sm:$0x1] }
  0xdd   : > { %v410_v18 = vunpack.c.l.b16 %v282_v26  ;;  %v1004_v26 = vsel %vm976_vm3, %v2021_v17, %v2396_v10 }
  0xdf   : > { %v426_v23 = vpack.c.b16 %v410_v18, %v410_v18 }
  0xe0   : > { %749 = vrot.lane.b32.xlu0 %v2251_v31, %s1904_s14 }
  0xe1   : > { %831 = vrot.lane.b32.xlu1 %v2313_v36, %s1907_s17  ;;  %796 = vrot.lane.b32.xlu2 %v2283_v3, %s1908_s18  ;;  %v561_v22 = vshll.u32 %v426_v23, 16 }
  0xe2   : > { %v638_v19 = vpop.permute.xlu0 %637 }
  0xe3   : > { %v756_v56 = vpop.permute.xlu1 %755  ;;  %v957_v44 = vpop.permute.xlu2 %956  ;;  %v990_v41 = vsel %vm976_vm3, %v2136_v45, %v638_v19  ;;  %v563_v0 = vrot.slane %v561_v22, 1 }
  0xe4   : > { %v1023_v53 = vsel %vm1009_vm4, %v990_v41, %v2361_v8  ;;  %v2444_v8 = vsel %vm657_vm0, %v673_v30, %v674_v62 }
  0xe5   : > { %v1056_v63 = vsel %vm1042_vm6, %v1023_v53, %v756_v56  ;;  %v1772_v53 = vld [vmem:[%s2000_s13 + $0xcc] sm:$0xff] }
  0xe8   : > { %972 = vrot.lane.b32.xlu0 %v2411_v46, %s1911_s26 }
  0xe9   : > { %915 = vrot.lane.b32.xlu1 %v2415_v57, %s1910_s20  ;;  %868 = vrot.lane.b32.xlu2 %v2381_v37, %s1906_s16 }
  0xea   : > { %v947_v35 = vpop.permute.xlu0 %946 }
  0xeb   : > { %v1211_v47 = vsel %vm1207_vm10, %v1178_v51, %v947_v35  ;;  %v875_v48 = vpop.permute.xlu1 %874  ;;  %v2428_v52 = vpop.permute.xlu2 %629  ;;  %v689_v51 = vrot.slane %v426_v23, 1 }
  0xec   : > { %1706 = vmatmul.msk.bf16.gmra.mxu0 %vm1264_vm11, %v1211_v47 }
  0xf0   : > { %641 = vrot.lane.b32.xlu0 %v2221_v60, %s1909_s19  ;;  %v1089_v60 = vsel %vm1075_vm5, %v1056_v63, %v803_v49 }
  0xf1   : > { %759 = vrot.lane.b32.xlu1 %v2316_v42, %s1904_s14  ;;  %722 = vrot.lane.b32.xlu2 %v2227_v7, %s1905_s15  ;;  %v556_v7 = vshll.u32 %v2448_v38, 16 }
  0xf2   : > { %v838_v50 = vpop.permute.xlu0 %837 }
  0xf3   : > { %v733_v1 = vpop.permute.xlu1 %732  ;;  %v889_v5 = vpop.permute.xlu2 %888  ;;  %v1122_v59 = vsel %vm1108_vm7, %v1089_v60, %v838_v50  ;;  %v558_v6 = vrot.slane %v556_v7, 1  ;;  %v900_v50 = vshll.u32 %v1772_v53, 16 }
  0xf4   : > { %v1155_v13 = vsel %vm1141_vm8, %v1122_v59, %v875_v48  ;;  %v303_v48 = vld [vmem:[%s2000_s13 + $0xd4] sm:$0x1]  ;;  %v1037_v60 = vsel %vm1009_vm4, %v1004_v26, %v733_v1  ;;  %v898_v59 = vshrl.u32 %v1772_v53, 16 }
  0xf5   : > { %v559_v56 = vor.u32 %v558_v6, %v554_v16  ;;  %v895_v30 = vunpack.c.l.b16 %v303_v48  ;;  %v902_v23 = vrot.slane %v900_v50, 1 }
  0xf7   : > { %v2474_v41 = vsel %vm432_vm1, %v559_v56, %v563_v0  ;;  %v903_v10 = vor.u32 %v902_v23, %v898_v59  ;;  %v941_v0 = vrot.slane %v1772_v53, 1  ;;  %v2549_v23 = vld [vmem:[%s2788_s3] ss:$0 sm:$0xff] }
  0xf8   : > { %950 = vrot.lane.b32.xlu0 %v2444_v8, %s1911_s26 }
  0xf9   : > { %878 = vrot.lane.b32.xlu1 %v2448_v38, %s1906_s16  ;;  %806 = vrot.lane.b32.xlu2 %v2344_v12, %s1908_s18 }
  0xfa   : > { %v922_v25 = vpop.permute.xlu0 %921 }
  0xfb   : > { %v1188_v49 = vsel %vm1174_vm9, %v1155_v13, %v922_v25  ;;  %v817_v24 = vpop.permute.xlu1 %816  ;;  %v2461_v19 = vpop.permute.xlu2 %794 }
  0xfc   : > { %v1221_v34 = vsel %vm1207_vm10, %v1188_v49, %v957_v44  ;;  %v688_v44 = vrot.slane %v2448_v38, 1 }
  0xfd   : > { %1711 = vmatmul.msk.bf16.vlgmr.msra.gmra.mxu1 %vm1264_vm11, %v1221_v34 }
  0xfe   : > { %v2478_v62 = vsel %vm657_vm0, %v688_v44, %v689_v51 }
 0x100   : > { %841 = vrot.lane.b32.xlu0 %v2350_v20, %s1907_s17 }
 0x101   : > { %736 = vrot.lane.b32.xlu1 %v2277_v61, %s1905_s15  ;;  %655 = vrot.lane.b32.xlu2 %v2248_v29, %s1909_s19  ;;  %v896_v29 = vpack.c.b16 %v895_v30, %v895_v30 }
 0x102   : > { %v770_v58 = vpop.permute.xlu0 %769 }
 0x103   : > { %v711_v35 = vpop.permute.xlu1 %710  ;;  %v867_v47 = vpop.permute.xlu2 %866  ;;  %v905_v7 = vshll.u32 %v896_v29, 16  ;;  %v1070_v25 = vsel %vm1042_vm6, %v1037_v60, %v770_v58  ;;  %v942_v58 = vrot.slane %v896_v29, 1 }
 0x104   : > { %v1103_v17 = vsel %vm1075_vm5, %v1070_v25, %v817_v24  ;;  %v982_v24 = vsel %vm976_vm3, %v2070_v2, %v2428_v52 }
 0x105   : > { %v907_v13 = vrot.slane %v905_v7, 1 }
 0x107   : > { %v908_v6 = vsel %vm432_vm1, %v903_v10, %v907_v13 }
 0x108   : > { %925 = vrot.lane.b32.xlu0 %v2474_v41, %s1910_s20 }
 0x109   : > { %820 = vrot.lane.b32.xlu1 %v2378_v54, %s1908_s18  ;;  %960 = vrot.lane.b32.xlu2 %v2478_v62, %s1911_s26 }
 0x10a   : > { %v852_v61 = vpop.permute.xlu0 %851 }
 0x10b   : > { %v936_v63 = vpop.permute.xlu1 %935  ;;  %v721_v18 = vpop.permute.xlu2 %720  ;;  %v1136_v1 = vsel %vm1108_vm7, %v1103_v17, %v852_v61 }
 0x10c   : > { %v1169_v16 = vsel %vm1141_vm8, %v1136_v1, %v889_v5 }
 0x110   : > { %773 = vrot.lane.b32.xlu0 %v2347_v15, %s1904_s14 }
 0x111   : > { %714 = vrot.lane.b32.xlu1 %v2313_v36, %s1905_s15  ;;  %633 = vrot.lane.b32.xlu2 %v2283_v3, %s1909_s19  ;;  %v1202_v36 = vsel %vm1174_vm9, %v1169_v16, %v936_v63 }
 0x112   : > { %v748_v54 = vpop.permute.xlu0 %747 }
 0x113   : > { %v830_v49 = vpop.permute.xlu1 %829  ;;  %v805_v34 = vpop.permute.xlu2 %804 }
 0x118   : > { %855 = vrot.lane.b32.xlu0 %v2411_v46, %s1907_s17  ;;  %v1015_v46 = vsel %vm1009_vm4, %v982_v24, %v711_v35  ;;  %v943_v35 = vsel %vm657_vm0, %v941_v0, %v942_v58 }
 0x119   : > { %939 = vrot.lane.b32.xlu1 %v908_v6, %s1910_s20  ;;  %892 = vrot.lane.b32.xlu2 %v1772_v53, %s1906_s16  ;;  %v1048_v56 = vsel %vm1042_vm6, %v1015_v46, %v748_v54 }
 0x11a   : > { %v971_v15 = vpop.permute.xlu0 %970  ;;  %v1081_v2 = vsel %vm1075_vm5, %v1048_v56, %v2461_v19 }
 0x11b   : > { %v1235_v3 = vsel %vm1207_vm10, %v1202_v36, %v971_v15  ;;  %v914_v5 = vpop.permute.xlu1 %913  ;;  %v2511_v22 = vpop.permute.xlu2 %653  ;;  %v1114_v48 = vsel %vm1108_vm7, %v1081_v2, %v830_v49  ;;  %v1838_v49 = vld [vmem:[%s2000_s13 + $0x84] sm:$0xff] }
 0x11c   : > { %1718 = vmatmul.msk.bf16.gmra.mxu2 %vm1264_vm11, %v1235_v3  ;;  %v1147_v53 = vsel %vm1141_vm8, %v1114_v48, %v867_v47 }
 0x11d   : > { %v1180_v30 = vsel %vm1174_vm9, %v1147_v53, %v914_v5 }
 0x120   : > { %751 = vrot.lane.b32.xlu0 %v2381_v37, %s1904_s14 }
 0x121   : > { %833 = vrot.lane.b32.xlu1 %v2444_v8, %s1907_s17  ;;  %798 = vrot.lane.b32.xlu2 %v2415_v57, %s1908_s18 }
 0x122   : > { %v640_v44 = vpop.permute.xlu0 %639 }
 0x123   : > { %v758_v52 = vpop.permute.xlu1 %757  ;;  %v959_v51 = vpop.permute.xlu2 %958  ;;  %v992_v26 = vsel %vm976_vm3, %v2158_v4, %v640_v44 }
 0x124   : > { %v1025_v47 = vsel %vm1009_vm4, %v992_v26, %v721_v18 }
 0x125   : > { %v1058_v59 = vsel %vm1042_vm6, %v1025_v47, %v758_v52 }
 0x128   : > { %974 = vrot.lane.b32.xlu0 %v943_v35, %s1911_s26 }
 0x129   : > { %917 = vrot.lane.b32.xlu1 %v2167_v11, %s1910_s20  ;;  %870 = vrot.lane.b32.xlu2 %v2136_v45, %s1906_s16 }
 0x12a   : > { %v949_v61 = vpop.permute.xlu0 %948 }
 0x12b   : > { %v1213_v19 = vsel %vm1207_vm10, %v1180_v30, %v949_v61  ;;  %v877_v29 = vpop.permute.xlu1 %876  ;;  %v2534_v50 = vpop.permute.xlu2 %631 }
 0x12c   : > { %1707 = vmatmul.msk.bf16.gmra.mxu0 %vm1264_vm11, %v1213_v19 }
 0x130   : > { %643 = vrot.lane.b32.xlu0 %v2344_v12, %s1909_s19  ;;  %v1365_v63 = vpop.f32.mrf.mxu2  ;;  %v1091_v12 = vsel %vm1075_vm5, %v1058_v59, %v805_v34 }
 0x131   : > { %761 = vrot.lane.b32.xlu1 %v2448_v38, %s1904_s14  ;;  %724 = vrot.lane.b32.xlu2 %v2350_v20, %s1905_s15  ;;  %v1366_v25 = vadd.f32 %v2549_v23, %v1365_v63 }
 0x132   : > { %v840_v60 = vpop.permute.xlu0 %839 }
 0x133   : > { %v735_v18 = vpop.permute.xlu1 %734  ;;  %v891_v7 = vpop.permute.xlu2 %890  ;;  %v1124_v54 = vsel %vm1108_vm7, %v1091_v12, %v840_v60  ;;  %v1412_v34 = vmax.f32 %v1366_v25, 0.0 }
 0x134   : > { %v1157_v1 = vsel %vm1141_vm8, %v1124_v54, %v877_v29 }
 0x138   : > { %952 = vrot.lane.b32.xlu0 %v2170_v14, %s1911_s26  ;;  %v1367_v17 = vpop.f32.mrf.mxu2 }
 0x139   : > { %v1368_v20 = vadd.f32 %v2549_v23, %v1367_v17  ;;  %v1310_v10 = vpop.f32.mrf.mxu0  ;;  %880 = vrot.lane.b32.xlu1 %v1838_v49, %s1906_s16  ;;  %808 = vrot.lane.b32.xlu2 %v2474_v41, %s1908_s18 }
 0x13a   : > { %v924_v13 = vpop.permute.xlu0 %923  ;;  %v1311_v5 = vadd.f32 %v2549_v23, %v1310_v10 }
 0x13b   : > { %v1413_v16 = vmax.f32 %v1368_v20, 0.0  ;;  %v1190_v6 = vsel %vm1174_vm9, %v1157_v1, %v924_v13  ;;  %v819_v36 = vpop.permute.xlu1 %818  ;;  %v797_v3 = vpop.permute.xlu2 %796 }
 0x13c   : > { %v1223_v15 = vsel %vm1207_vm10, %v1190_v6, %v959_v51  ;;  %v1390_v58 = vmax.f32 %v1311_v5, 0.0 }
 0x13d   : > { %1712 = vmatmul.msk.bf16.gmra.mxu1 %vm1264_vm11, %v1223_v15  ;;  %v2565_v24 = vpack.c.bf16 %v1413_v16, %v1412_v34 }
 0x140   : > { %843 = vrot.lane.b32.xlu0 %v2478_v62, %s1907_s17 }
 0x141   : > { %v1312_v46 = vpop.f32.mrf.mxu0  ;;  %635 = vrot.lane.b32.xlu1 %v2415_v57, %s1909_s19  ;;  %927 = vrot.lane.b32.xlu2 %v2061_v55, %s1910_s20  ;;  %v1006_v57 = vsel %vm976_vm3, %v2106_v28, %v2511_v22 }
 0x142   : > { %v1313_v56 = vadd.f32 %v2549_v23, %v1312_v46  ;;  %v772_v0 = vpop.permute.xlu0 %771  ;;  %v1039_v30 = vsel %vm1009_vm4, %v1006_v57, %v735_v18 }
 0x143   : > { %v713_v2 = vpop.permute.xlu1 %712  ;;  %v869_v52 = vpop.permute.xlu2 %868  ;;  %v1072_v61 = vsel %vm1042_vm6, %v1039_v30, %v772_v0 }
 0x144   : > { %v1391_v44 = vmax.f32 %v1313_v56, 0.0 }
 0x146   : > { %v2575_v51 = vpack.c.bf16 %v1391_v44, %v1390_v58 }
 0x148   : > { %962 = vrot.lane.b32.xlu0 %v2028_v21, %s1911_s26 }
 0x149   : > { %800 = vrot.lane.b32.xlu1 %v2167_v11, %s1908_s18  ;;  %716 = vrot.lane.b32.xlu2 %v2444_v8, %s1905_s15  ;;  %v1105_v11 = vsel %vm1075_vm5, %v1072_v61, %v819_v36 }
 0x14a   : > { %v854_v35 = vpop.permute.xlu0 %853 }
 0x14b   : > { %v938_v48 = vpop.permute.xlu1 %937  ;;  %v723_v53 = vpop.permute.xlu2 %722  ;;  %v1138_v28 = vsel %vm1108_vm7, %v1105_v11, %v854_v35 }
 0x14c   : > { %v1171_v29 = vsel %vm1141_vm8, %v1138_v28, %v891_v7 }
 0x150   : > { %753 = vrot.lane.b32.xlu0 %v2136_v45, %s1904_s14  ;;  %v1204_v45 = vsel %vm1174_vm9, %v1171_v29, %v938_v48 }
 0x151   : > { %645 = vrot.lane.b32.xlu1 %v2474_v41, %s1909_s19  ;;  %835 = vrot.lane.b32.xlu2 %v2170_v14, %s1907_s17  ;;  %v984_v41 = vsel %vm976_vm3, %v2125_v39, %v2534_v50  ;;  %s1561_s19 = scalar_lea.hbm %s2791_s6, %s1968_s25 }
 0x152   : > { %v750_v19 = vpop.permute.xlu0 %749  ;;  %s1565_s11 = sshll.u32 %s1561_s19, 4  ;;  %s1566_s11 = int_to_ptr.hbm [resolvable:$true] %s1565_s11 }
 0x153   : > { %v832_v8 = vpop.permute.xlu1 %831  ;;  %v807_v22 = vpop.permute.xlu2 %806  ;;  %s1854_s28 = sshra.s32 %s1566_s11, 4  ;;  %s1855_s28 = int_to_ptr.hbm [resolvable:$true] %s1854_s28 }
 0x154   : > { %s1856_s29 = scalar_lea.hbm %s1855_s28, 1  ;;  %p1861_p0 = scmp.lt.s32.totalorder %s1855_s28, %s2791_s6 }
 0x155   : > { %p1857_p11 = scmp.ne.s32.totalorder %s1855_s28, %s1856_s29 }
 0x157   : > { %p1858_p12 = pnand %p1857_p11, %p1985_p5 }
 0x158   : > { %872 = vrot.lane.b32.xlu0 %v2158_v4, %s1906_s16  ;;  %v1017_v4 = vsel %vm1009_vm4, %v984_v41, %v713_v2 }
 0x159   : > { %954 = vrot.lane.b32.xlu1 %v2199_v40, %s1911_s26  ;;  %919 = vrot.lane.b32.xlu2 %v2188_v33, %s1910_s20  ;;  %v1050_v60 = vsel %vm1042_vm6, %v1017_v4, %v750_v19  ;;  %p1859_p13 = pneg %p1858_p12 }
 0x15a   : > { %v973_v26 = vpop.permute.xlu0 %972  ;;  %v1083_v39 = vsel %vm1075_vm5, %v1050_v60, %v797_v3 }
 0x15b   : > { %v1237_v14 = vsel %vm1207_vm10, %v1204_v45, %v973_v26  ;;  %v916_v47 = vpop.permute.xlu1 %915  ;;  %v656_v63 = vpop.permute.xlu2 %655  ;;  %v1116_v50 = vsel %vm1108_vm7, %v1083_v39, %v832_v8 }
 0x15c   : > { %1719 = vmatmul.msk.bf16.gmra.mxu2 %vm1264_vm11, %v1237_v14  ;;  %v1149_v18 = vsel %vm1141_vm8, %v1116_v50, %v869_v52  ;;  %v1008_v35 = vsel %vm976_vm3, %v2224_v9, %v656_v63 }
 0x160   : > { %726 = vrot.lane.b32.xlu0 %v2478_v62, %s1905_s15  ;;  %v1182_v62 = vsel %vm1174_vm9, %v1149_v18, %v916_v47 }
 0x161   : > { %845 = vrot.lane.b32.xlu1 %v2028_v21, %s1907_s17  ;;  %763 = vrot.lane.b32.xlu2 %v1838_v49, %s1904_s14  ;;  %v1839_v21 = vld [vmem:[%s2000_s13 + $0x90] sm:$0xff]  ;;  %s1860_s14 = scalar_lea.hbm %s2791_s6, 2 }
 0x162   : > { %v642_v40 = vpop.permute.xlu0 %641  ;;  %p1862_p1 = scmp.lt.s32.totalorder %s1860_s14, %s1856_s29 }
 0x163   : > { %v760_v33 = vpop.permute.xlu1 %759  ;;  %v961_v59 = vpop.permute.xlu2 %960 }
 0x164   : > { %p1863_p2 = por %p1862_p1, %p1861_p0 }
 0x166   : > { %p1864_p3 = pnand %p1863_p2, %p1859_p13 }
 0x168   : > { %810 = vrot.lane.b32.xlu0 %v2061_v55, %s1908_s18  ;;  %v994_v55 = vsel %vm976_vm3, %v2185_v32, %v642_v40 }
 0x169   : > { %v1315_v7 = vpop.f32.mrf.mxu0  ;;  %964 = vrot.lane.b32.xlu1 %v2034_v27, %s1911_s26  ;;  %882 = vrot.lane.b32.xlu2 %v1839_v21, %s1906_s16  ;;  %v1027_v17 = vsel %vm1009_vm4, %v994_v55, %v723_v53  ;;  %s242_s16 = sand.u32 1, %s1894_s22  }
 0x16a   : > { %v951_v12 = vpop.permute.xlu0 %950  ;;  %v1316_v20 = vadd.f32 %v2549_v23, %v1315_v7  ;;  %v1060_v49 = vsel %vm1042_vm6, %v1027_v17, %v760_v33  ;;  %s243_s9 = scalar_lea.vmem [#allocation2], %s242_s16  ;;  %s1553_s12 = scalar_lea.sflag [#allocation3], %s242_s16 }
 0x16b   : > { %v1215_v25 = vsel %vm1207_vm10, %v1182_v62, %v951_v12  ;;  %v879_v54 = vpop.permute.xlu1 %878  ;;  %v634_v27 = vpop.permute.xlu2 %633  ;;  %v1093_v36 = vsel %vm1075_vm5, %v1060_v49, %v807_v22  ;;  %s1563_s10 = sshll.u32 %s243_s9, 4  ;;  %s1564_s10 = int_to_ptr.vmem [resolvable:$true] %s1563_s10 }
 0x16c   : > { %1708 = vmatmul.msk.bf16.gmra.mxu0 %vm1264_vm11, %v1215_v25  ;;  %v1392_v34 = vmax.f32 %v1316_v20, 0.0  ;;  %v986_v26 = vsel %vm976_vm3, %v2251_v31, %v634_v27 }
 0x170   : > { %929 = vrot.lane.b32.xlu0 %v2051_v43, %s1910_s20 }
 0x171   : > { %v1317_v10 = vpop.f32.mrf.mxu0 }
 0x172   : > { %v1318_v13 = vadd.f32 %v2549_v23, %v1317_v10  ;;  %v842_v1 = vpop.permute.xlu0 %841 }
 0x173   : > { %v737_v6 = vpop.permute.xlu1 %736  ;;  %v1126_v15 = vsel %vm1108_vm7, %v1093_v36, %v842_v1  ;;  %v893_v46 = vpop.permute.xlu2 %892 }
 0x174   : > { %v1393_v16 = vmax.f32 %v1318_v13, 0.0  ;;  %v1159_v5 = vsel %vm1141_vm8, %v1126_v15, %v879_v54  ;;  %v1041_v48 = vsel %vm1009_vm4, %v1008_v35, %v737_v6 }
 0x176   : > { %v2637_v32 = vpack.c.bf16 %v1393_v16, %v1392_v34 }
 0x17a   : > { %v926_v3 = vpop.permute.xlu0 %925  ;;  %v1340_v33 = vpop.f32.mrf.mxu1 }
 0x17b   : > { %v1192_v43 = vsel %vm1174_vm9, %v1159_v5, %v926_v3  ;;  %v821_v56 = vpop.permute.xlu1 %820  ;;  %v799_v2 = vpop.permute.xlu2 %798 }
 0x17c   : > { %v1225_v0 = vsel %vm1207_vm10, %v1192_v43, %v961_v59 }
 0x17d   : > { %1713 = vmatmul.msk.bf16.gmra.mxu1 %vm1264_vm11, %v1225_v0 }
 0x182   : > { %v774_v58 = vpop.permute.xlu0 %773  ;;  %v1342_v54 = vpop.f32.mrf.mxu1 }
 0x183   : > { %v715_v44 = vpop.permute.xlu1 %714  ;;  %v871_v53 = vpop.permute.xlu2 %870  ;;  %v1074_v30 = vsel %vm1042_vm6, %v1041_v48, %v774_v58  ;;  %v1343_v43 = vadd.f32 %v2549_v23, %v1342_v54 }
 0x184   : > { %v1107_v19 = vsel %vm1075_vm5, %v1074_v30, %v821_v56  ;;  %v1019_v41 = vsel %vm1009_vm4, %v986_v26, %v715_v44  ;;  %v1341_v44 = vadd.f32 %v2549_v23, %v1340_v33 }
 0x185   : > { %v1403_v35 = vmax.f32 %v1343_v43, 0.0 }
 0x186   : > { %v1402_v48 = vmax.f32 %v1341_v44, 0.0 }
 0x18a   : > { %v856_v52 = vpop.permute.xlu0 %855 }
 0x18b   : > { %v940_v57 = vpop.permute.xlu1 %939  ;;  %v1140_v11 = vsel %vm1108_vm7, %v1107_v19, %v856_v52  ;;  %v725_v22 = vpop.permute.xlu2 %724 }
 0x18c   : > { %v1173_v8 = vsel %vm1141_vm8, %v1140_v11, %v893_v46  ;;  %v1429_v11 = vpack.c.bf16 %v1403_v35, %v1402_v48 }
 0x18d   : > { %v1206_v29 = vsel %vm1174_vm9, %v1173_v8, %v940_v57 }
 0x192   : > { %v752_v61 = vpop.permute.xlu0 %751 }
 0x193   : > { %v834_v28 = vpop.permute.xlu1 %833  ;;  %v1052_v47 = vsel %vm1042_vm6, %v1019_v41, %v752_v61  ;;  %v809_v60 = vpop.permute.xlu2 %808 }
 0x194   : > { %v1085_v4 = vsel %vm1075_vm5, %v1052_v47, %v799_v2 }
 0x195   : > { %v1118_v39 = vsel %vm1108_vm7, %v1085_v4, %v834_v28 }
 0x196   : > { %v1151_v50 = vsel %vm1141_vm8, %v1118_v39, %v871_v53 }
 0x19a   : > { %v975_v45 = vpop.permute.xlu0 %974 }
 0x19b   : > { %v1239_v9 = vsel %vm1207_vm10, %v1206_v29, %v975_v45  ;;  %v918_v14 = vpop.permute.xlu1 %917  ;;  %v928_v62 = vpop.permute.xlu2 %927 }
 0x19c   : > { %1720 = vmatmul.msk.bf16.gmra.mxu2 %vm1264_vm11, %v1239_v9  ;;  %v1184_v59 = vsel %vm1174_vm9, %v1151_v50, %v918_v14 }
 0x1a2   : > { %v644_v63 = vpop.permute.xlu0 %643 }
 0x1a3   : > { %v762_v40 = vpop.permute.xlu1 %761  ;;  %v996_v31 = vsel %vm976_vm3, %v2316_v42, %v644_v63  ;;  %v717_v27 = vpop.permute.xlu2 %716 }
 0x1a4   : > { %v1029_v21 = vsel %vm1009_vm4, %v996_v31, %v725_v22 }
 0x1a5   : > { %v1062_v25 = vsel %vm1042_vm6, %v1029_v21, %v762_v40 }
 0x1a6   : > { %v1095_v17 = vsel %vm1075_vm5, %v1062_v25, %v809_v60 }
 0x1aa   : > { %v953_v18 = vpop.permute.xlu0 %952 }
 0x1ab   : > { %v1217_v7 = vsel %vm1207_vm10, %v1184_v59, %v953_v18  ;;  %v881_v12 = vpop.permute.xlu1 %880  ;;  %v836_v6 = vpop.permute.xlu2 %835 }
 0x1ac   : > { %1709 = vmatmul.msk.bf16.gmra.mxu0 %vm1264_vm11, %v1217_v7 }
 0x1b2   : > { %v844_v55 = vpop.permute.xlu0 %843 }
 0x1b3   : > { %v1128_v20 = vsel %vm1108_vm7, %v1095_v17, %v844_v55  ;;  %v636_v10 = vpop.permute.xlu1 %635  ;;  %v920_v53 = vpop.permute.xlu2 %919 }
 0x1b4   : > { %v1161_v42 = vsel %vm1141_vm8, %v1128_v20, %v881_v12  ;;  %v988_v36 = vsel %vm976_vm3, %v2381_v37, %v636_v10  ;;  %v1320_v12 = vpop.f32.mrf.mxu0 }
 0x1b5   : > { %v1194_v49 = vsel %vm1174_vm9, %v1161_v42, %v928_v62  ;;  %v1021_v46 = vsel %vm1009_vm4, %v988_v36, %v717_v27 }
 0x1ba   : > { %v963_v13 = vpop.permute.xlu0 %962  ;;  %v1345_v1 = vpop.f32.mrf.mxu1 }
 0x1bb   : > { %v1227_v34 = vsel %vm1207_vm10, %v1194_v49, %v963_v13  ;;  %v801_v16 = vpop.permute.xlu1 %800  ;;  %v1346_v15 = vadd.f32 %v2549_v23, %v1345_v1  ;;  %v764_v45 = vpop.permute.xlu2 %763 }
 0x1bc   : > { %1714 = vmatmul.msk.bf16.gmra.mxu1 %vm1264_vm11, %v1227_v34  ;;  %v1322_v25 = vpop.f32.mrf.mxu0 }
 0x1bd   : > { %v1404_v2 = vmax.f32 %v1346_v15, 0.0 }
 0x1c2   : > { %v754_v3 = vpop.permute.xlu0 %753  ;;  %v1347_v5 = vpop.f32.mrf.mxu1 }
 0x1c3   : > { %v1348_v56 = vadd.f32 %v2549_v23, %v1347_v5  ;;  %v1054_v0 = vsel %vm1042_vm6, %v1021_v46, %v754_v3  ;;  %v646_v58 = vpop.permute.xlu1 %645  ;;  %v883_v60 = vpop.permute.xlu2 %882 }
 0x1c4   : > { %v1087_v37 = vsel %vm1075_vm5, %v1054_v0, %v801_v16  ;;  %v998_v9 = vsel %vm976_vm3, %v2448_v38, %v646_v58  ;;  %v1370_v38 = vpop.f32.mrf.mxu2 }
 0x1c5   : > { %v1405_v52 = vmax.f32 %v1348_v56, 0.0  ;;  %v1120_v30 = vsel %vm1108_vm7, %v1087_v37, %v836_v6  ;;  %v1371_v46 = vadd.f32 %v2549_v23, %v1370_v38 }
 0x1c7   : > { %v1430_v57 = vpack.c.bf16 %v1405_v52, %v1404_v2  ;;  %v1414_v44 = vmax.f32 %v1371_v46, 0.0 }
 0x1c9   : > { %1445 = vmatpush.bf16.msrb.mxu1 %v1430_v57 }
 0x1ca   : > { %v873_v61 = vpop.permute.xlu0 %872 }
 0x1cb   : > { %v1153_v19 = vsel %vm1141_vm8, %v1120_v30, %v873_v61  ;;  %v955_v8 = vpop.permute.xlu1 %954  ;;  %v1422_v30 = vld [vmem:[%s2786_s1] sm:$0x3] }
 0x1cc   : > { %v1186_v28 = vsel %vm1174_vm9, %v1153_v19, %v920_v53  ;;  %v1372_v31 = vpop.f32.mrf.mxu2  ;;  %1440 = vst [vmem:[#allocation1] ss:$9 sm:$0xff] %v1422_v30 }
 0x1cd   : > { %1446 = vmatpush.bf16.msrb.mxu1 %v1429_v11  ;;  %v1219_v22 = vsel %vm1207_vm10, %v1186_v28, %v955_v8  ;;  %v1373_v15 = vadd.f32 %v2549_v23, %v1372_v31 }
 0x1ce   : > { %1710 = vmatmul.msk.bf16.gmra.mxu0 %vm1264_vm11, %v1219_v22 }
 0x1cf   : > { %v1415_v0 = vmax.f32 %v1373_v15, 0.0 }
 0x1d1   : > { %v1435_v2 = vpack.c.bf16 %v1415_v0, %v1414_v44 }
 0x1d2   : > { %v727_v29 = vpop.permute.xlu0 %726 }
 0x1d3   : > { %v846_v26 = vpop.permute.xlu1 %845  ;;  %v1031_v14 = vsel %vm1009_vm4, %v998_v9, %v727_v29  ;;  %v1442_v15 = vld [vmem:[#allocation1 + $0x9] sm:$0xff] }
 0x1d4   : > { %v1064_v47 = vsel %vm1042_vm6, %v1031_v14, %v764_v45  ;;  %v1375_v18 = vpop.f32.mrf.mxu2 }
 0x1d5   : > { %v1376_v6 = vadd.f32 %v2549_v23, %v1375_v18  ;;  %v1780_v18 = vld [vmem:[%s2789_s4 + $0x28] sm:$0xff] }
 0x1d7   : > { %v1416_v56 = vmax.f32 %v1376_v6, 0.0 }
 0x1da   : > { %v811_v41 = vpop.permute.xlu0 %810 }
 0x1db   : > { %v1097_v63 = vsel %vm1075_vm5, %v1064_v47, %v811_v41  ;;  %v965_v40 = vpop.permute.xlu1 %964  ;;  %v1323_v47 = vadd.f32 %v2549_v23, %v1322_v25  ;;  %v1778_v25 = vld [vmem:[%s2789_s4 + $0x18] sm:$0xff] }
 0x1dc   : > { %v1130_v4 = vsel %vm1108_vm7, %v1097_v63, %v846_v26  ;;  %v1377_v7 = vpop.f32.mrf.mxu2 }
 0x1dd   : > { %v1163_v39 = vsel %vm1141_vm8, %v1130_v4, %v883_v60  ;;  %v1378_v49 = vadd.f32 %v2549_v23, %v1377_v7  ;;  %v1782_v60 = vld [vmem:[%s2789_s4 + $0x38] sm:$0xff] }
 0x1de   : > { %1538 = vmatpush.bf16.msra.mxu3 %v1782_v60 }
 0x1df   : > { %v1417_v3 = vmax.f32 %v1378_v49, 0.0 }
 0x1e1   : > { %v1436_v58 = vpack.c.bf16 %v1417_v3, %v1416_v56  ;;  %v1776_v3 = vld [vmem:[%s2789_s4 + $0x8] sm:$0xff] }
 0x1e2   : > { %v930_v33 = vpop.permute.xlu0 %929 }
 0x1e3   : > { %v1196_v50 = vsel %vm1174_vm9, %v1163_v39, %v930_v33  ;;  %v1781_v33 = vld [vmem:[%s2789_s4 + $0x30] sm:$0xff] }
 0x1e4   : > { %v1229_v59 = vsel %vm1207_vm10, %v1196_v50, %v965_v40  ;;  %v1380_v62 = vpop.f32.mrf.mxu2  ;;  %v1321_v40 = vadd.f32 %v2549_v23, %v1320_v12  ;;  %v1395_v50 = vmax.f32 %v1323_v47, 0.0  ;;  %1539 = vmatpush.bf16.msra.mxu3 %v1781_v33 }
 0x1e5   : > { %1715 = vmatmul.msk.bf16.gmra.mxu1 %vm1264_vm11, %v1229_v59  ;;  %v1381_v42 = vadd.f32 %v2549_v23, %v1380_v62  ;;  %v1779_v62 = vld [vmem:[%s2789_s4 + $0x20] sm:$0xff] }
 0x1e6   : > { %v1394_v38 = vmax.f32 %v1321_v40, 0.0 }
 0x1e7   : > { %v1418_v36 = vmax.f32 %v1381_v42, 0.0 }
 0x1e8   : > { %v1425_v7 = vpack.c.bf16 %v1395_v50, %v1394_v38  ;;  %1540 = vmatpush.bf16.msra.mxu3 %v1780_v18 }
 0x1e9   : > { %v1325_v17 = vpop.f32.mrf.mxu0 }
 0x1ea   : > { %v1326_v26 = vadd.f32 %v2549_v23, %v1325_v17 }
 0x1ec   : > { %v1382_v21 = vpop.f32.mrf.mxu2  ;;  %v1396_v39 = vmax.f32 %v1326_v26, 0.0  ;;  %1541 = vmatpush.bf16.msra.mxu3 %v1779_v62 }
 0x1ed   : > { %v1383_v10 = vadd.f32 %v2549_v23, %v1382_v21 }
 0x1ef   : > { %v1419_v34 = vmax.f32 %v1383_v10, 0.0 }
 0x1f0   : > { %1542 = vmatpush.bf16.msra.mxu3 %v1778_v25 }
 0x1f1   : > { %v1437_v5 = vpack.c.bf16 %v1419_v34, %v1418_v36  ;;  %v1327_v43 = vpop.f32.mrf.mxu0 }
 0x1f2   : > { %v1328_v29 = vadd.f32 %v2549_v23, %v1327_v43 }
 0x1f4   : > { %v1397_v63 = vmax.f32 %v1328_v29, 0.0 }
 0x1f6   : > { %v1426_v59 = vpack.c.bf16 %v1397_v63, %v1396_v39 }
 0x1fa   : > { %v1350_v35 = vpop.f32.mrf.mxu1 }
 0x1fb   : > { %v1351_v49 = vadd.f32 %v2549_v23, %v1350_v35 }
 0x1fd   : > { %v1406_v36 = vmax.f32 %v1351_v49, 0.0 }
 0x202   : > { %v1352_v57 = vpop.f32.mrf.mxu1 }
 0x203   : > { %v1353_v42 = vadd.f32 %v2549_v23, %v1352_v57 }
 0x21f   : > { %v1385_v54 = vpop.f32.mrf.mxu2 }
 0x220   : > { %v1386_v55 = vadd.f32 %v2549_v23, %v1385_v54 }
 0x222   : > { %v1420_v13 = vmax.f32 %v1386_v55, 0.0 }
 0x227   : > { %v1387_v20 = vpop.f32.mrf.mxu2 }
 0x228   : > { %v1388_v27 = vadd.f32 %v2549_v23, %v1387_v20 }
 0x229   : > { %v1330_v52 = vpop.f32.mrf.mxu0 }
 0x22a   : > { %v1421_v1 = vmax.f32 %v1388_v27, 0.0  ;;  %v1331_v8 = vadd.f32 %v2549_v23, %v1330_v52  ;;  %v1441_v27 = vld [vmem:[#allocation1] sm:$0xff] }
 0x22c   : > { %v1438_v16 = vpack.c.bf16 %v1421_v1, %v1420_v13  ;;  %v1398_v14 = vmax.f32 %v1331_v8, 0.0 }
 0x22e   : > { %1458 = vmatpush.bf16.msrb.mxu2 %v1438_v16  ;;  %v1407_v16 = vmax.f32 %v1353_v42, 0.0 }
 0x231   : > { %v1332_v37 = vpop.f32.mrf.mxu0 }
 0x232   : > { %1459 = vmatpush.bf16.msrb.mxu2 %v1437_v5  ;;  %v1333_v11 = vadd.f32 %v2549_v23, %v1332_v37 }
 0x234   : > { %v1399_v45 = vmax.f32 %v1333_v11, 0.0 }
 0x236   : > { %1460 = vmatpush.bf16.msrb.mxu2 %v1436_v58  ;;  %v1427_v4 = vpack.c.bf16 %v1399_v45, %v1398_v14 }
 0x239   : > { %v1355_v53 = vpop.f32.mrf.mxu1 }
 0x23a   : > { %1461 = vmatpush.bf16.msrb.mxu2 %v1435_v2  ;;  %v1356_v17 = vadd.f32 %v2549_v23, %v1355_v53  ;;  %v1489_v2 = vld [vmem:[%s2790_s5] sm:$0x1] }
 0x23c   : > { %v1408_v34 = vmax.f32 %v1356_v17, 0.0 }
 0x23e   : > { %1462 = vmatpush.bf16.msrb.mxu2 %v2565_v24 }
 0x241   : > { %v1357_v41 = vpop.f32.mrf.mxu1 }
 0x242   : > { %v1358_v54 = vadd.f32 %v2549_v23, %v1357_v41 }
 0x244   : > { %v1409_v13 = vmax.f32 %v1358_v54, 0.0 }
 0x246   : > { %v1432_v6 = vpack.c.bf16 %v1409_v13, %v1408_v34 }
 0x24b   : > { %v1335_v48 = vpop.f32.mrf.mxu0 }
 0x24c   : > { %v1336_v61 = vadd.f32 %v2549_v23, %v1335_v48 }
 0x24e   : > { %v1400_v22 = vmax.f32 %v1336_v61, 0.0 }
 0x253   : > { %v1337_v19 = vpop.f32.mrf.mxu0 }
 0x254   : > { %v1338_v28 = vadd.f32 %v2549_v23, %v1337_v19 }
 0x256   : > { %v1401_v24 = vmax.f32 %v1338_v28, 0.0 }
 0x258   : > { %v1428_v9 = vpack.c.bf16 %v1401_v24, %v1400_v22 }
 0x25a   : > { %1447 = vmatpush.bf16.msrb.mxu1 %v1428_v9 }
 0x25e   : > { %1448 = vmatpush.bf16.msrb.mxu1 %v1427_v4 }
 0x262   : > { %v1360_v31 = vpop.f32.mrf.mxu1  ;;  %1449 = vmatpush.bf16.msrb.mxu1 %v1426_v59 }
 0x263   : > { %v1361_v12 = vadd.f32 %v2549_v23, %v1360_v31 }
 0x265   : > { %v1410_v20 = vmax.f32 %v1361_v12, 0.0 }
 0x266   : > { %1450 = vmatpush.bf16.msrb.mxu1 %v1425_v7 }
 0x26a   : > { %v1362_v21 = vpop.f32.mrf.mxu1  ;;  %1451 = vmatpush.bf16.msrb.mxu1 %v2637_v32  ;;  %v1777_v32 = vld [vmem:[%s2789_s4 + $0x10] sm:$0xff] }
 0x26b   : > { %v1363_v55 = vadd.f32 %v2549_v23, %v1362_v21  ;;  %1543 = vmatpush.bf16.msra.mxu3 %v1777_v32  ;;  %v1775_v23 = vld [vmem:[%s2789_s4] sm:$0xff] }
 0x26d   : > { %v1411_v10 = vmax.f32 %v1363_v55, 0.0 }
 0x26e   : > { %1452 = vmatpush.bf16.msrb.mxu1 %v2575_v51  ;;  %v1431_v51 = vpack.c.bf16 %v1407_v16, %v1406_v36 }
 0x26f   : > { %v1433_v1 = vpack.c.bf16 %v1411_v10, %v1410_v20  ;;  %1544 = vmatpush.bf16.msra.mxu3 %v1776_v3 }
 0x271   : > { %1463 = vmatpush.bf16.msrb.mxu2 %v1433_v1  ;;  %1453 = vmatmul.bf16.vlgmr.msrb.gmra.mxu1 %v1441_v27 }
 0x273   : > { %1545 = vmatpush.bf16.msra.mxu3 %v1775_v23 }
 0x275   : > { %1464 = vmatpush.bf16.msrb.mxu2 %v1432_v6 }
 0x279   : > { %1465 = vmatpush.bf16.msrb.mxu2 %v1431_v51 }
 0x27c   : > { %1466 = vmatmul.bf16.vlgmr.msrb.gmra.mxu2 %v1442_v15 }
 0x2ee   : > { %v1454_v5 = vpop.f32.mrf.mxu1 }
 0x2f6   : > { %v1456_v43 = vpop.f32.mrf.mxu1 }
 0x2ff   : > { %v1467_v46 = vpop.f32.mrf.mxu2 }
 0x300   : > { %v1468_v56 = vadd.f32 %v1467_v46, %v1454_v5 }
 0x302   : > { %v1471_v0 = vmul.f32 0.00390625, %v1468_v56 }
 0x304   : > { %v1472_v58 = vpack.c.bf16 %v1471_v0, %v1471_v0 }
 0x306   : > { %1546 = vmatmul.bf16.vlgmr.msra.gmra.mxu3 %v1472_v58 }
 0x307   : > { %v1469_v44 = vpop.f32.mrf.mxu2 }
 0x389   : > { %v1547_v52 = vpop.f32.mrf.mxu3 }
 0x38a   : > { %v1548_v35 = vadd.f32 %v1547_v52, %v1489_v2 }
 0x38c   : > { %1551 = vst [vmem:[%s243_s9] sm:$0x1] %v1548_v35 }
 0x38d   : > { %1867 = shalt.err (!%p1864_p3)
}
 0x38e   : > { %1790 = dma.vmem_to_hbm [thread:$0]  (%p1985_p5), %s1564_s10, 16, %s1566_s11, %s1553_s12  }
 0x391   : > { %v1549_v37 = vpop.f32.mrf.mxu3 }
 0x392 PF: > { %p1796_p4 = scmp.ge.s32.totalorder %s1902_s24, 2  ;;  %s1577_s16 = sand.u32 1, %s1890_s21  }
 0x393   : > { %s1578_s18 = scalar_lea.sflag [#allocation3], %s1577_s16 }
 0x394   : > { %p1793_p7 = pnand %p1796_p4, %p1989_p6 }
 0x396   : > { %p1794_p8 = pneg %p1793_p7 }
 0x398   : > { %1885 = dma.done.wait (%p1794_p8), %s1578_s18, 16  }
 0x399   : > { %1887 = vsyncadd (%p1794_p8), %s1578_s18, 4294967280  ;;  %p16_p9 = scmp.ge.s32.totalorder %s1972_s27, 4   ;;  %s2794_s21 = smov %s1894_s22 }
 0x39a   : > { %s2795_s22 = smov %s1898_s23  ;;  %s2796_s23 = smov %s1983_s30 }
 0x39b   : > { %s2797_s24 = smov %s1972_s27  ;;  %18 = sbr.rel (!%p16_p9) target bundleno = 3 (0x3), region = 79 }
 0x3a0   :  { %1583 = vsyncpa [#allocation3], 1 }
 0x3a1   :  { %1585 = vsyncpa [#allocation3 + $0x1], 1 }

</bundles_post_ra>
